<compile_context>
chip_gen: v7x
topology: tpu7x:2x2x1
jax: 0.10.0
libtpu: 0.0.40
codegen_flags: <defaults>
</compile_context>

<pallas_src>
import functools

import jax
import jax.numpy as jnp
from jax import lax
from jax.experimental import pallas as pl
from jax.experimental.pallas import tpu as pltpu


# ----------------------------- in-kernel helpers -----------------------------

def _layernorm(x, w, b, eps=1e-5):
    # matches torch.nn.LayerNorm (biased variance, eps inside sqrt); f32 math
    mu = jnp.mean(x, axis=-1, keepdims=True)
    var = jnp.mean(jnp.square(x - mu), axis=-1, keepdims=True)
    return (x - mu) * lax.rsqrt(var + eps) * w + b


# --------------------------------- kernel ------------------------------------

def vit_blocks_kernel(patch_ref, pw_ref, tokb_ref,
                      ln1w, ln1b, wqkv, wproj, bproj,
                      ln2w, ln2b, wfc1, bfc1, wfc2, bfc2,
                      normw, normb,
                      o_ref, tok_ref,
                      *, num_heads, n_real):
    """Grid = (depth, batch), depth outer.  One (layer, image) per grid step.

    tok_ref: persistent (B, N, D) f32 VMEM scratch holding the residual stream
    of every image across the whole depth sweep."""
    l = pl.program_id(0)
    b = pl.program_id(1)

    # ---- layer 0: fused patch embedding + CLS token + pos_embed add ----
    @pl.when(l == 0)
    def _():
        emb = jnp.dot(patch_ref[0], pw_ref[...],
                      preferred_element_type=jnp.float32)            # (N, D) f32
        # tokb rows: [cls + pos0 ; proj_b + pos[1:] ; zeros]; patch row 0 and
        # padded rows are zero, so this reproduces concat([cls, proj(x)]) + pos.
        tok_ref[b] = emb + tokb_ref[...]

    x = tok_ref[b]                                   # (N, D) f32 residual stream
    N, D = x.shape
    hd = D // num_heads
    scale = hd ** -0.5

    # --------------------------- attention branch ---------------------------
    h = _layernorm(x, ln1w[0], ln1b[0])
    qkv = jnp.dot(h.astype(jnp.bfloat16), wqkv[0],
                  preferred_element_type=jnp.float32)                # (N, 3D) f32
    q = qkv[:, 0:D]
    kT = qkv[:, D:2 * D].T.astype(jnp.bfloat16)      # (D, N): one transpose/layer
    v = qkv[:, 2 * D:3 * D].astype(jnp.bfloat16)     # (N, D)

    kmask = None
    if N > n_real:                                   # mask padded key columns
        kmask = lax.broadcasted_iota(jnp.int32, (1, N), 1) < n_real

    ctx_parts = []
    for hidx in range(num_heads):                    # static unroll over heads
        sl = slice(hidx * hd, (hidx + 1) * hd)
        qh = (q[:, sl] * scale).astype(jnp.bfloat16)                 # (N, hd)
        s = jnp.dot(qh, kT[sl, :], preferred_element_type=jnp.float32)  # (N, N)
        if kmask is not None:
            s = jnp.where(kmask, s, -1e30)
        s = s - jnp.max(s, axis=-1, keepdims=True)
        e = jnp.exp(s)                                               # f32
        denom = jnp.sum(e, axis=-1, keepdims=True)                   # (N, 1)
        pv = jnp.dot(e.astype(jnp.bfloat16), v[:, sl],
                     preferred_element_type=jnp.float32)             # (N, hd)
        ctx_parts.append(pv * pl.reciprocal(denom, approx=True))
    ctx = jnp.concatenate(ctx_parts, axis=-1)                        # (N, D) f32

    attn = jnp.dot(ctx.astype(jnp.bfloat16), wproj[0],
                   preferred_element_type=jnp.float32) + bproj[0]
    x1 = x + attn

    # ------------------------------ MLP branch ------------------------------
    h2 = _layernorm(x1, ln2w[0], ln2b[0])
    h2 = jnp.dot(h2.astype(jnp.bfloat16), wfc1[0],
                 preferred_element_type=jnp.float32) + bfc1[0]
    # tanh-approximate GELU (EUP); torch default nn.GELU() is exact erf.
    h2 = jax.nn.gelu(h2, approximate=True)
    h2 = jnp.dot(h2.astype(jnp.bfloat16), wfc2[0],
                 preferred_element_type=jnp.float32) + bfc2[0]
    x2 = x1 + h2

    tok_ref[b] = x2

    # Final LayerNorm of the CLS token only (LayerNorm is per-token, so
    # norm(x)[:, 0] == norm(x[:, 0])).  Written every step so the out window
    # never holds garbage; the last layer's writeback is the surviving value.
    # Head is Identity (num_classes=0).
    o_ref[0] = _layernorm(x2[0:1, :], normw[...], normb[...])


# ------------------------------ pallas wrapper --------------------------------

def _vmem_limit_bytes():
    # v7x: 64 MiB physical per TC -> ~48 MiB; v5e/v6e: 128 MiB -> 96 MiB.
    # Leave ~25% headroom for compiler-internal scratch.
    try:
        cap = int(pltpu.get_tpu_info().vmem_capacity_bytes)
    except Exception:
        cap = 64 * 1024 * 1024
    return max(32 * 1024 * 1024, min(96 * 1024 * 1024, (cap * 3) // 4))


def vit_blocks_call(patches, tok_bias, params, cfg, n_real):
    B, N, Pdim = patches.shape
    D = cfg["embed_dim"]
    depth = cfg["depth"]
    Dh = params["w_fc1"].shape[-1]

    wmap = lambda l, b: (l, 0, 0)      # per-layer stacked weight slab (depth-indexed)
    const2 = lambda l, b: (0, 0)       # grid-invariant -> fetched once, stays resident

    kernel = functools.partial(vit_blocks_kernel,
                               num_heads=cfg["num_heads"], n_real=n_real)
    out = pl.pallas_call(
        kernel,
        out_shape=jax.ShapeDtypeStruct((B, 1, D), jnp.float32),
        grid=(depth, B),                       # depth OUTER: weights fetched once/layer
        in_specs=[
            pl.BlockSpec((1, N, Pdim), lambda l, b: (b, 0, 0)),   # patches (bf16)
            pl.BlockSpec((Pdim, D), const2),                      # proj_w (bf16), resident
            pl.BlockSpec((N, D), const2),                         # token bias (f32), resident
            pl.BlockSpec((1, 1, D), wmap),        # ln1_w
            pl.BlockSpec((1, 1, D), wmap),        # ln1_b
            pl.BlockSpec((1, D, 3 * D), wmap),    # w_qkv (bf16)
            pl.BlockSpec((1, D, D), wmap),        # w_proj (bf16)
            pl.BlockSpec((1, 1, D), wmap),        # b_proj
            pl.BlockSpec((1, 1, D), wmap),        # ln2_w
            pl.BlockSpec((1, 1, D), wmap),        # ln2_b
            pl.BlockSpec((1, D, Dh), wmap),       # w_fc1 (bf16)
            pl.BlockSpec((1, 1, Dh), wmap),       # b_fc1
            pl.BlockSpec((1, Dh, D), wmap),       # w_fc2 (bf16)
            pl.BlockSpec((1, 1, D), wmap),        # b_fc2
            pl.BlockSpec((1, D), const2),         # final norm_w, resident
            pl.BlockSpec((1, D), const2),         # final norm_b, resident
        ],
        out_specs=pl.BlockSpec((1, 1, D), lambda l, b: (b, 0, 0)),
        scratch_shapes=[pltpu.VMEM((B, N, D), jnp.float32)],       # residual streams
        compiler_params=pltpu.CompilerParams(
            dimension_semantics=("arbitrary", "arbitrary"),
            vmem_limit_bytes=_vmem_limit_bytes()),
    )(patches, params["proj_w"], tok_bias,
      params["ln1_w"], params["ln1_b"], params["w_qkv"],
      params["w_proj"], params["b_proj"],
      params["ln2_w"], params["ln2_b"],
      params["w_fc1"], params["b_fc1"], params["w_fc2"], params["b_fc2"],
      params["norm_w"], params["norm_b"])
    return out[:, 0, :]                                            # (B, D)


# ------------------------------- model wrapper --------------------------------

def extract_patches(x, p):
    """NCHW image -> (B, num_patches, C*p*p), same patch order as
    Conv2d(stride=p).flatten(2).transpose(1, 2)."""
    B, C, H, W = x.shape
    gh, gw = H // p, W // p
    x = x.reshape(B, C, gh, p, gw, p)
    x = x.transpose(0, 2, 4, 1, 3, 5)             # (B, gh, gw, C, p, p)
    return x.reshape(B, gh * gw, C * p * p)


def vit_forward(x, params, cfg):
    """== VisionTransformer.forward(x, norm=True) with num_classes=0 and
    pre_norm=False, eval mode.  Returns the normalized CLS embedding (B, D)."""
    p = cfg["patch_size"]
    D = cfg["embed_dim"]

    patches = extract_patches(x, p)               # (B, Np, Pdim) f32
    B, Np, Pdim = patches.shape
    n_real = Np + 1                               # + CLS token
    n_pad = ((n_real + 15) // 16) * 16            # multiple of 16 (bf16 packing)
    pad_rows = n_pad - n_real

    # leading zero row = CLS slot, trailing zero rows = padding
    patches = jnp.pad(patches, ((0, 0), (1, pad_rows), (0, 0))).astype(jnp.bfloat16)

    pos = params["pos_embed"][0]                  # (n_real, D) f32
    tok_bias = jnp.concatenate([
        params["cls_token"].reshape(1, D) + pos[0:1],   # CLS row
        params["proj_b"] + pos[1:],                     # patch rows (proj bias + pos)
        jnp.zeros((pad_rows, D), jnp.float32),          # padded rows
    ], axis=0)                                          # (n_pad, D)

    return vit_blocks_call(patches, tok_bias, params, cfg, n_real)


def init_vit_params(key, *, img_size, patch_size, in_chans, embed_dim,
                    depth, num_heads, mlp_ratio):
    D = embed_dim
    Dh = int(D * mlp_ratio)
    Pdim = in_chans * patch_size * patch_size
    num_patches = (img_size // patch_size) ** 2
    N = num_patches + 1
    bf16 = jnp.bfloat16

    keys = iter(jax.random.split(key, 8))

    def tnormal(shape, std=0.02):
        return jax.random.truncated_normal(next(keys), -2.0, 2.0, shape,
                                           jnp.float32) * std

    return {
        "cls_token": tnormal((1, 1, D)),
        "pos_embed": tnormal((1, N, D)),
        # Conv2d weight (D, C, p, p) flattened & transposed to (Pdim, D)
        "proj_w": tnormal((D, in_chans, patch_size, patch_size))
                  .reshape(D, Pdim).T.astype(bf16),
        "proj_b": jnp.zeros((1, D), jnp.float32),
        "norm_w": jnp.ones((1, D), jnp.float32),
        "norm_b": jnp.zeros((1, D), jnp.float32),
        # per-layer weights stacked along depth for the fused block kernel
        "ln1_w": jnp.ones((depth, 1, D), jnp.float32),
        "ln1_b": jnp.zeros((depth, 1, D), jnp.float32),
        "w_qkv": tnormal((depth, D, 3 * D)).astype(bf16),   # qkv_bias=False
        "w_proj": tnormal((depth, D, D)).astype(bf16),
        "b_proj": jnp.zeros((depth, 1, D), jnp.float32),
        "ln2_w": jnp.ones((depth, 1, D), jnp.float32),
        "ln2_b": jnp.zeros((depth, 1, D), jnp.float32),
        "w_fc1": tnormal((depth, D, Dh)).astype(bf16),
        "b_fc1": jnp.zeros((depth, 1, Dh), jnp.float32),
        "w_fc2": tnormal((depth, Dh, D)).astype(bf16),
        "b_fc2": jnp.zeros((depth, 1, D), jnp.float32),
    }


# ------------------------------------ main ------------------------------------

if __name__ == "__main__":
    cfg = dict(img_size=16, patch_size=8, in_chans=3, embed_dim=32,
               depth=2, num_heads=4, mlp_ratio=4.0)

    key = jax.random.PRNGKey(0)
    pkey, xkey = jax.random.split(key)
    params = init_vit_params(pkey, **cfg)

    x = jax.random.normal(
        xkey, (2, cfg["in_chans"], cfg["img_size"], cfg["img_size"]), jnp.float32)

    fwd = jax.jit(functools.partial(vit_forward, cfg=cfg))
    out = jax.block_until_ready(fwd(x, params))
    assert out.shape == (2, cfg["embed_dim"]), out.shape
    assert bool(jnp.all(jnp.isfinite(out)))
    print("KERNEL_OK")
</pallas_src>

<mosaic_0001>
module attributes {stable_mosaic.version = 11 : i64} {
  func.func @vit_blocks_kernel(%arg0: i32, %arg1: i32, %arg2: memref<1x16x192xbf16, #tpu.memory_space<vmem>>, %arg3: memref<192x32xbf16, #tpu.memory_space<vmem>>, %arg4: memref<16x32xf32, #tpu.memory_space<vmem>>, %arg5: memref<1x1x32xf32, #tpu.memory_space<vmem>>, %arg6: memref<1x1x32xf32, #tpu.memory_space<vmem>>, %arg7: memref<1x32x96xbf16, #tpu.memory_space<vmem>>, %arg8: memref<1x32x32xbf16, #tpu.memory_space<vmem>>, %arg9: memref<1x1x32xf32, #tpu.memory_space<vmem>>, %arg10: memref<1x1x32xf32, #tpu.memory_space<vmem>>, %arg11: memref<1x1x32xf32, #tpu.memory_space<vmem>>, %arg12: memref<1x32x128xbf16, #tpu.memory_space<vmem>>, %arg13: memref<1x1x128xf32, #tpu.memory_space<vmem>>, %arg14: memref<1x128x32xbf16, #tpu.memory_space<vmem>>, %arg15: memref<1x1x32xf32, #tpu.memory_space<vmem>>, %arg16: memref<1x32xf32, #tpu.memory_space<vmem>>, %arg17: memref<1x32xf32, #tpu.memory_space<vmem>>, %arg18: memref<1x1x32xf32, #tpu.memory_space<vmem>>, %arg19: memref<2x16x32xf32, #tpu.memory_space<vmem>>) attributes {dimension_semantics = [#tpu.dimension_semantics<arbitrary>, #tpu.dimension_semantics<arbitrary>], iteration_bounds = array<i64: 2, 2>, scalar_prefetch = 0 : i64, scratch_operands = 1 : i64, tpu.core_type = #tpu.core_type<tc>, window_params = [{transform_indices = @transform_0, window_bounds = array<i64: 1, 16, 192>}, {pipeline_mode = #tpu.pipeline_mode<synchronous>, transform_indices = @transform_1, window_bounds = array<i64: 192, 32>}, {pipeline_mode = #tpu.pipeline_mode<synchronous>, transform_indices = @transform_2, window_bounds = array<i64: 16, 32>}, {transform_indices = @transform_3, window_bounds = array<i64: 1, 1, 32>}, {transform_indices = @transform_4, window_bounds = array<i64: 1, 1, 32>}, {transform_indices = @transform_5, window_bounds = array<i64: 1, 32, 96>}, {transform_indices = @transform_6, window_bounds = array<i64: 1, 32, 32>}, {transform_indices = @transform_7, window_bounds = array<i64: 1, 1, 32>}, {transform_indices = @transform_8, window_bounds = array<i64: 1, 1, 32>}, {transform_indices = @transform_9, window_bounds = array<i64: 1, 1, 32>}, {transform_indices = @transform_10, window_bounds = array<i64: 1, 32, 128>}, {transform_indices = @transform_11, window_bounds = array<i64: 1, 1, 128>}, {transform_indices = @transform_12, window_bounds = array<i64: 1, 128, 32>}, {transform_indices = @transform_13, window_bounds = array<i64: 1, 1, 32>}, {pipeline_mode = #tpu.pipeline_mode<synchronous>, transform_indices = @transform_14, window_bounds = array<i64: 1, 32>}, {pipeline_mode = #tpu.pipeline_mode<synchronous>, transform_indices = @transform_15, window_bounds = array<i64: 1, 32>}, {transform_indices = @transform_16, window_bounds = array<i64: 1, 1, 32>}]} {
    %c0_i32 = arith.constant 0 : i32
    %0 = arith.cmpi eq, %arg0, %c0_i32 : i32
    %1 = arith.extui %0 : i1 to i32
    %c0_i32_0 = arith.constant 0 : i32
    %2 = arith.cmpi ne, %1, %c0_i32_0 : i32
    scf.if %2 {
      %c0_90 = arith.constant 0 : index
      %c0_91 = arith.constant 0 : index
      %c0_92 = arith.constant 0 : index
      %233 = vector.load %arg2[%c0_90, %c0_91, %c0_92] : memref<1x16x192xbf16, #tpu.memory_space<vmem>>, vector<1x16x192xbf16>
      %234 = vector.shape_cast %233 : vector<1x16x192xbf16> to vector<16x192xbf16>
      %c0_93 = arith.constant 0 : index
      %c0_94 = arith.constant 0 : index
      %235 = vector.load %arg3[%c0_93, %c0_94] : memref<192x32xbf16, #tpu.memory_space<vmem>>, vector<192x32xbf16>
      %cst_95 = arith.constant dense<0.000000e+00> : vector<16x32xf32>
      %236 = tpu.matmul %234, %235, %cst_95 {dimension_numbers = #tpu.dot_dimension_numbers<[1], [0], [0], [1], [0, 0, 1, 1], [], []>} : vector<16x192xbf16>, vector<192x32xbf16>, vector<16x32xf32> -> vector<16x32xf32>
      %c0_96 = arith.constant 0 : index
      %c0_97 = arith.constant 0 : index
      %237 = vector.load %arg4[%c0_96, %c0_97] : memref<16x32xf32, #tpu.memory_space<vmem>>, vector<16x32xf32>
      %238 = arith.addf %236, %237 : vector<16x32xf32>
      %239 = arith.index_cast %arg1 : i32 to index
      %c0_98 = arith.constant 0 : index
      %c0_99 = arith.constant 0 : index
      %240 = vector.load %arg19[%239, %c0_98, %c0_99] : memref<2x16x32xf32, #tpu.memory_space<vmem>>, vector<1x16x32xf32>
      %241 = vector.shape_cast %240 : vector<1x16x32xf32> to vector<16x32xf32>
      %242 = vector.shape_cast %238 : vector<16x32xf32> to vector<1x16x32xf32>
      tpu.vector_store %arg19[%239, %c0_98, %c0_99], %242 {strides = array<i32>} : memref<2x16x32xf32, #tpu.memory_space<vmem>>, vector<1x16x32xf32>,
    } else {
    }
    %3 = arith.index_cast %arg1 : i32 to index
    %c0 = arith.constant 0 : index
    %c0_1 = arith.constant 0 : index
    %4 = vector.load %arg19[%3, %c0, %c0_1] : memref<2x16x32xf32, #tpu.memory_space<vmem>>, vector<1x16x32xf32>
    %5 = vector.shape_cast %4 : vector<1x16x32xf32> to vector<16x32xf32>
    %c0_2 = arith.constant 0 : index
    %c0_3 = arith.constant 0 : index
    %c0_4 = arith.constant 0 : index
    %6 = vector.load %arg5[%c0_2, %c0_3, %c0_4] : memref<1x1x32xf32, #tpu.memory_space<vmem>>, vector<1x1x32xf32>
    %7 = vector.shape_cast %6 : vector<1x1x32xf32> to vector<1x32xf32>
    %c0_5 = arith.constant 0 : index
    %c0_6 = arith.constant 0 : index
    %c0_7 = arith.constant 0 : index
    %8 = vector.load %arg6[%c0_5, %c0_6, %c0_7] : memref<1x1x32xf32, #tpu.memory_space<vmem>>, vector<1x1x32xf32>
    %9 = vector.shape_cast %8 : vector<1x1x32xf32> to vector<1x32xf32>
    %cst = arith.constant dense<0.000000e+00> : vector<16xf32>
    %10 = vector.multi_reduction <add>, %5, %cst [1] : vector<16x32xf32> to vector<16xf32>
    %11 = vector.shape_cast %10 : vector<16xf32> to vector<16x1xf32>
    %cst_8 = arith.constant 3.200000e+01 : f32
    %12 = vector.broadcast %cst_8 : f32 to vector<16x1xf32>
    %13 = arith.divf %11, %12 : vector<16x1xf32>
    %14 = vector.broadcast %13 : vector<16x1xf32> to vector<16x32xf32>
    %15 = arith.subf %5, %14 : vector<16x32xf32>
    %16 = arith.mulf %15, %15 : vector<16x32xf32>
    %cst_9 = arith.constant dense<0.000000e+00> : vector<16xf32>
    %17 = vector.multi_reduction <add>, %16, %cst_9 [1] : vector<16x32xf32> to vector<16xf32>
    %18 = vector.shape_cast %17 : vector<16xf32> to vector<16x1xf32>
    %cst_10 = arith.constant 3.200000e+01 : f32
    %19 = vector.broadcast %cst_10 : f32 to vector<16x1xf32>
    %20 = arith.divf %18, %19 : vector<16x1xf32>
    %21 = vector.broadcast %13 : vector<16x1xf32> to vector<16x32xf32>
    %22 = arith.subf %5, %21 : vector<16x32xf32>
    %cst_11 = arith.constant 9.99999974E-6 : f32
    %23 = vector.broadcast %cst_11 : f32 to vector<16x1xf32>
    %24 = arith.addf %20, %23 : vector<16x1xf32>
    %25 = math.rsqrt %24 : vector<16x1xf32>
    %26 = vector.broadcast %25 : vector<16x1xf32> to vector<16x32xf32>
    %27 = arith.mulf %22, %26 : vector<16x32xf32>
    %28 = vector.broadcast %7 : vector<1x32xf32> to vector<16x32xf32>
    %29 = arith.mulf %27, %28 : vector<16x32xf32>
    %30 = vector.broadcast %9 : vector<1x32xf32> to vector<16x32xf32>
    %31 = arith.addf %29, %30 : vector<16x32xf32>
    %32 = arith.truncf %31 : vector<16x32xf32> to vector<16x32xbf16>
    %c0_12 = arith.constant 0 : index
    %c0_13 = arith.constant 0 : index
    %c0_14 = arith.constant 0 : index
    %33 = vector.load %arg7[%c0_12, %c0_13, %c0_14] : memref<1x32x96xbf16, #tpu.memory_space<vmem>>, vector<1x32x96xbf16>
    %34 = vector.shape_cast %33 : vector<1x32x96xbf16> to vector<32x96xbf16>
    %cst_15 = arith.constant dense<0.000000e+00> : vector<16x96xf32>
    %35 = tpu.matmul %32, %34, %cst_15 {dimension_numbers = #tpu.dot_dimension_numbers<[1], [0], [0], [1], [0, 0, 1, 1], [], []>} : vector<16x32xbf16>, vector<32x96xbf16>, vector<16x96xf32> -> vector<16x96xf32>
    %36 = vector.extract_strided_slice %35 {offsets = [0, 0], sizes = [16, 32], strides = [1, 1]} : vector<16x96xf32> to vector<16x32xf32>
    %37 = vector.extract_strided_slice %35 {offsets = [0, 32], sizes = [16, 32], strides = [1, 1]} : vector<16x96xf32> to vector<16x32xf32>
    %38 = tpu.transpose %37, [1, 0] : vector<16x32xf32> -> vector<32x16xf32>
    %39 = arith.truncf %38 : vector<32x16xf32> to vector<32x16xbf16>
    %40 = vector.extract_strided_slice %35 {offsets = [0, 64], sizes = [16, 32], strides = [1, 1]} : vector<16x96xf32> to vector<16x32xf32>
    %41 = arith.truncf %40 : vector<16x32xf32> to vector<16x32xbf16>
    %42 = tpu.iota {dimensions = array<i32: 1>} : vector<1x16xi32>
    %c5_i32 = arith.constant 5 : i32
    %43 = vector.broadcast %c5_i32 : i32 to vector<1x16xi32>
    %44 = arith.cmpi slt, %42, %43 : vector<1x16xi32>
    %45 = vector.extract_strided_slice %36 {offsets = [0, 0], sizes = [16, 8], strides = [1, 1]} : vector<16x32xf32> to vector<16x8xf32>
    %cst_16 = arith.constant 0.353553385 : f32
    %46 = vector.broadcast %cst_16 : f32 to vector<16x8xf32>
    %47 = arith.mulf %45, %46 : vector<16x8xf32>
    %48 = arith.truncf %47 : vector<16x8xf32> to vector<16x8xbf16>
    %49 = vector.extract_strided_slice %39 {offsets = [0, 0], sizes = [8, 16], strides = [1, 1]} : vector<32x16xbf16> to vector<8x16xbf16>
    %cst_17 = arith.constant dense<0.000000e+00> : vector<16x16xf32>
    %50 = tpu.matmul %48, %49, %cst_17 {dimension_numbers = #tpu.dot_dimension_numbers<[1], [0], [0], [1], [0, 0, 1, 1], [], []>} : vector<16x8xbf16>, vector<8x16xbf16>, vector<16x16xf32> -> vector<16x16xf32>
    %cst_18 = arith.constant -1.000000e+30 : f32
    %51 = vector.shape_cast %44 : vector<1x16xi1> to vector<1x16xi1>
    %52 = vector.broadcast %51 : vector<1x16xi1> to vector<16x16xi1>
    %53 = vector.broadcast %cst_18 : f32 to vector<16x16xf32>
    %54 = arith.select %52, %50, %53 : vector<16x16xi1>, vector<16x16xf32>
    %cst_19 = arith.constant dense<0xFF800000> : vector<16xf32>
    %55 = vector.multi_reduction <maximumf>, %54, %cst_19 [1] : vector<16x16xf32> to vector<16xf32>
    %56 = vector.shape_cast %55 : vector<16xf32> to vector<16x1xf32>
    %57 = vector.broadcast %56 : vector<16x1xf32> to vector<16x16xf32>
    %58 = arith.subf %54, %57 : vector<16x16xf32>
    %59 = math.exp %58 : vector<16x16xf32>
    %cst_20 = arith.constant dense<0.000000e+00> : vector<16xf32>
    %60 = vector.multi_reduction <add>, %59, %cst_20 [1] : vector<16x16xf32> to vector<16xf32>
    %61 = vector.shape_cast %60 : vector<16xf32> to vector<16x1xf32>
    %62 = arith.truncf %59 : vector<16x16xf32> to vector<16x16xbf16>
    %63 = vector.extract_strided_slice %41 {offsets = [0, 0], sizes = [16, 8], strides = [1, 1]} : vector<16x32xbf16> to vector<16x8xbf16>
    %cst_21 = arith.constant dense<0.000000e+00> : vector<16x8xf32>
    %64 = tpu.matmul %62, %63, %cst_21 {dimension_numbers = #tpu.dot_dimension_numbers<[1], [0], [0], [1], [0, 0, 1, 1], [], []>} : vector<16x16xbf16>, vector<16x8xbf16>, vector<16x8xf32> -> vector<16x8xf32>
    %65 = tpu.reciprocal %61 {approx = true} : vector<16x1xf32> -> vector<16x1xf32>
    %66 = vector.broadcast %65 : vector<16x1xf32> to vector<16x8xf32>
    %67 = arith.mulf %64, %66 : vector<16x8xf32>
    %68 = vector.extract_strided_slice %36 {offsets = [0, 8], sizes = [16, 8], strides = [1, 1]} : vector<16x32xf32> to vector<16x8xf32>
    %cst_22 = arith.constant 0.353553385 : f32
    %69 = vector.broadcast %cst_22 : f32 to vector<16x8xf32>
    %70 = arith.mulf %68, %69 : vector<16x8xf32>
    %71 = arith.truncf %70 : vector<16x8xf32> to vector<16x8xbf16>
    %72 = vector.extract_strided_slice %39 {offsets = [8, 0], sizes = [8, 16], strides = [1, 1]} : vector<32x16xbf16> to vector<8x16xbf16>
    %cst_23 = arith.constant dense<0.000000e+00> : vector<16x16xf32>
    %73 = tpu.matmul %71, %72, %cst_23 {dimension_numbers = #tpu.dot_dimension_numbers<[1], [0], [0], [1], [0, 0, 1, 1], [], []>} : vector<16x8xbf16>, vector<8x16xbf16>, vector<16x16xf32> -> vector<16x16xf32>
    %cst_24 = arith.constant -1.000000e+30 : f32
    %74 = vector.shape_cast %44 : vector<1x16xi1> to vector<1x16xi1>
    %75 = vector.broadcast %74 : vector<1x16xi1> to vector<16x16xi1>
    %76 = vector.broadcast %cst_24 : f32 to vector<16x16xf32>
    %77 = arith.select %75, %73, %76 : vector<16x16xi1>, vector<16x16xf32>
    %cst_25 = arith.constant dense<0xFF800000> : vector<16xf32>
    %78 = vector.multi_reduction <maximumf>, %77, %cst_25 [1] : vector<16x16xf32> to vector<16xf32>
    %79 = vector.shape_cast %78 : vector<16xf32> to vector<16x1xf32>
    %80 = vector.broadcast %79 : vector<16x1xf32> to vector<16x16xf32>
    %81 = arith.subf %77, %80 : vector<16x16xf32>
    %82 = math.exp %81 : vector<16x16xf32>
    %cst_26 = arith.constant dense<0.000000e+00> : vector<16xf32>
    %83 = vector.multi_reduction <add>, %82, %cst_26 [1] : vector<16x16xf32> to vector<16xf32>
    %84 = vector.shape_cast %83 : vector<16xf32> to vector<16x1xf32>
    %85 = arith.truncf %82 : vector<16x16xf32> to vector<16x16xbf16>
    %86 = vector.extract_strided_slice %41 {offsets = [0, 8], sizes = [16, 8], strides = [1, 1]} : vector<16x32xbf16> to vector<16x8xbf16>
    %cst_27 = arith.constant dense<0.000000e+00> : vector<16x8xf32>
    %87 = tpu.matmul %85, %86, %cst_27 {dimension_numbers = #tpu.dot_dimension_numbers<[1], [0], [0], [1], [0, 0, 1, 1], [], []>} : vector<16x16xbf16>, vector<16x8xbf16>, vector<16x8xf32> -> vector<16x8xf32>
    %88 = tpu.reciprocal %84 {approx = true} : vector<16x1xf32> -> vector<16x1xf32>
    %89 = vector.broadcast %88 : vector<16x1xf32> to vector<16x8xf32>
    %90 = arith.mulf %87, %89 : vector<16x8xf32>
    %91 = vector.extract_strided_slice %36 {offsets = [0, 16], sizes = [16, 8], strides = [1, 1]} : vector<16x32xf32> to vector<16x8xf32>
    %cst_28 = arith.constant 0.353553385 : f32
    %92 = vector.broadcast %cst_28 : f32 to vector<16x8xf32>
    %93 = arith.mulf %91, %92 : vector<16x8xf32>
    %94 = arith.truncf %93 : vector<16x8xf32> to vector<16x8xbf16>
    %95 = vector.extract_strided_slice %39 {offsets = [16, 0], sizes = [8, 16], strides = [1, 1]} : vector<32x16xbf16> to vector<8x16xbf16>
    %cst_29 = arith.constant dense<0.000000e+00> : vector<16x16xf32>
    %96 = tpu.matmul %94, %95, %cst_29 {dimension_numbers = #tpu.dot_dimension_numbers<[1], [0], [0], [1], [0, 0, 1, 1], [], []>} : vector<16x8xbf16>, vector<8x16xbf16>, vector<16x16xf32> -> vector<16x16xf32>
    %cst_30 = arith.constant -1.000000e+30 : f32
    %97 = vector.shape_cast %44 : vector<1x16xi1> to vector<1x16xi1>
    %98 = vector.broadcast %97 : vector<1x16xi1> to vector<16x16xi1>
    %99 = vector.broadcast %cst_30 : f32 to vector<16x16xf32>
    %100 = arith.select %98, %96, %99 : vector<16x16xi1>, vector<16x16xf32>
    %cst_31 = arith.constant dense<0xFF800000> : vector<16xf32>
    %101 = vector.multi_reduction <maximumf>, %100, %cst_31 [1] : vector<16x16xf32> to vector<16xf32>
    %102 = vector.shape_cast %101 : vector<16xf32> to vector<16x1xf32>
    %103 = vector.broadcast %102 : vector<16x1xf32> to vector<16x16xf32>
    %104 = arith.subf %100, %103 : vector<16x16xf32>
    %105 = math.exp %104 : vector<16x16xf32>
    %cst_32 = arith.constant dense<0.000000e+00> : vector<16xf32>
    %106 = vector.multi_reduction <add>, %105, %cst_32 [1] : vector<16x16xf32> to vector<16xf32>
    %107 = vector.shape_cast %106 : vector<16xf32> to vector<16x1xf32>
    %108 = arith.truncf %105 : vector<16x16xf32> to vector<16x16xbf16>
    %109 = vector.extract_strided_slice %41 {offsets = [0, 16], sizes = [16, 8], strides = [1, 1]} : vector<16x32xbf16> to vector<16x8xbf16>
    %cst_33 = arith.constant dense<0.000000e+00> : vector<16x8xf32>
    %110 = tpu.matmul %108, %109, %cst_33 {dimension_numbers = #tpu.dot_dimension_numbers<[1], [0], [0], [1], [0, 0, 1, 1], [], []>} : vector<16x16xbf16>, vector<16x8xbf16>, vector<16x8xf32> -> vector<16x8xf32>
    %111 = tpu.reciprocal %107 {approx = true} : vector<16x1xf32> -> vector<16x1xf32>
    %112 = vector.broadcast %111 : vector<16x1xf32> to vector<16x8xf32>
    %113 = arith.mulf %110, %112 : vector<16x8xf32>
    %114 = vector.extract_strided_slice %36 {offsets = [0, 24], sizes = [16, 8], strides = [1, 1]} : vector<16x32xf32> to vector<16x8xf32>
    %cst_34 = arith.constant 0.353553385 : f32
    %115 = vector.broadcast %cst_34 : f32 to vector<16x8xf32>
    %116 = arith.mulf %114, %115 : vector<16x8xf32>
    %117 = arith.truncf %116 : vector<16x8xf32> to vector<16x8xbf16>
    %118 = vector.extract_strided_slice %39 {offsets = [24, 0], sizes = [8, 16], strides = [1, 1]} : vector<32x16xbf16> to vector<8x16xbf16>
    %cst_35 = arith.constant dense<0.000000e+00> : vector<16x16xf32>
    %119 = tpu.matmul %117, %118, %cst_35 {dimension_numbers = #tpu.dot_dimension_numbers<[1], [0], [0], [1], [0, 0, 1, 1], [], []>} : vector<16x8xbf16>, vector<8x16xbf16>, vector<16x16xf32> -> vector<16x16xf32>
    %cst_36 = arith.constant -1.000000e+30 : f32
    %120 = vector.shape_cast %44 : vector<1x16xi1> to vector<1x16xi1>
    %121 = vector.broadcast %120 : vector<1x16xi1> to vector<16x16xi1>
    %122 = vector.broadcast %cst_36 : f32 to vector<16x16xf32>
    %123 = arith.select %121, %119, %122 : vector<16x16xi1>, vector<16x16xf32>
    %cst_37 = arith.constant dense<0xFF800000> : vector<16xf32>
    %124 = vector.multi_reduction <maximumf>, %123, %cst_37 [1] : vector<16x16xf32> to vector<16xf32>
    %125 = vector.shape_cast %124 : vector<16xf32> to vector<16x1xf32>
    %126 = vector.broadcast %125 : vector<16x1xf32> to vector<16x16xf32>
    %127 = arith.subf %123, %126 : vector<16x16xf32>
    %128 = math.exp %127 : vector<16x16xf32>
    %cst_38 = arith.constant dense<0.000000e+00> : vector<16xf32>
    %129 = vector.multi_reduction <add>, %128, %cst_38 [1] : vector<16x16xf32> to vector<16xf32>
    %130 = vector.shape_cast %129 : vector<16xf32> to vector<16x1xf32>
    %131 = arith.truncf %128 : vector<16x16xf32> to vector<16x16xbf16>
    %132 = vector.extract_strided_slice %41 {offsets = [0, 24], sizes = [16, 8], strides = [1, 1]} : vector<16x32xbf16> to vector<16x8xbf16>
    %cst_39 = arith.constant dense<0.000000e+00> : vector<16x8xf32>
    %133 = tpu.matmul %131, %132, %cst_39 {dimension_numbers = #tpu.dot_dimension_numbers<[1], [0], [0], [1], [0, 0, 1, 1], [], []>} : vector<16x16xbf16>, vector<16x8xbf16>, vector<16x8xf32> -> vector<16x8xf32>
    %134 = tpu.reciprocal %130 {approx = true} : vector<16x1xf32> -> vector<16x1xf32>
    %135 = vector.broadcast %134 : vector<16x1xf32> to vector<16x8xf32>
    %136 = arith.mulf %133, %135 : vector<16x8xf32>
    %137 = tpu.concatenate %67, %90, %113, %136 in 1 : vector<16x8xf32>, vector<16x8xf32>, vector<16x8xf32>, vector<16x8xf32> -> vector<16x32xf32>
    %138 = arith.truncf %137 : vector<16x32xf32> to vector<16x32xbf16>
    %c0_40 = arith.constant 0 : index
    %c0_41 = arith.constant 0 : index
    %c0_42 = arith.constant 0 : index
    %139 = vector.load %arg8[%c0_40, %c0_41, %c0_42] : memref<1x32x32xbf16, #tpu.memory_space<vmem>>, vector<1x32x32xbf16>
    %140 = vector.shape_cast %139 : vector<1x32x32xbf16> to vector<32x32xbf16>
    %cst_43 = arith.constant dense<0.000000e+00> : vector<16x32xf32>
    %141 = tpu.matmul %138, %140, %cst_43 {dimension_numbers = #tpu.dot_dimension_numbers<[1], [0], [0], [1], [0, 0, 1, 1], [], []>} : vector<16x32xbf16>, vector<32x32xbf16>, vector<16x32xf32> -> vector<16x32xf32>
    %c0_44 = arith.constant 0 : index
    %c0_45 = arith.constant 0 : index
    %c0_46 = arith.constant 0 : index
    %142 = vector.load %arg9[%c0_44, %c0_45, %c0_46] : memref<1x1x32xf32, #tpu.memory_space<vmem>>, vector<1x1x32xf32>
    %143 = vector.shape_cast %142 : vector<1x1x32xf32> to vector<1x32xf32>
    %144 = vector.broadcast %143 : vector<1x32xf32> to vector<16x32xf32>
    %145 = arith.addf %141, %144 : vector<16x32xf32>
    %146 = arith.addf %5, %145 : vector<16x32xf32>
    %c0_47 = arith.constant 0 : index
    %c0_48 = arith.constant 0 : index
    %c0_49 = arith.constant 0 : index
    %147 = vector.load %arg10[%c0_47, %c0_48, %c0_49] : memref<1x1x32xf32, #tpu.memory_space<vmem>>, vector<1x1x32xf32>
    %148 = vector.shape_cast %147 : vector<1x1x32xf32> to vector<1x32xf32>
    %c0_50 = arith.constant 0 : index
    %c0_51 = arith.constant 0 : index
    %c0_52 = arith.constant 0 : index
    %149 = vector.load %arg11[%c0_50, %c0_51, %c0_52] : memref<1x1x32xf32, #tpu.memory_space<vmem>>, vector<1x1x32xf32>
    %150 = vector.shape_cast %149 : vector<1x1x32xf32> to vector<1x32xf32>
    %cst_53 = arith.constant dense<0.000000e+00> : vector<16xf32>
    %151 = vector.multi_reduction <add>, %146, %cst_53 [1] : vector<16x32xf32> to vector<16xf32>
    %152 = vector.shape_cast %151 : vector<16xf32> to vector<16x1xf32>
    %cst_54 = arith.constant 3.200000e+01 : f32
    %153 = vector.broadcast %cst_54 : f32 to vector<16x1xf32>
    %154 = arith.divf %152, %153 : vector<16x1xf32>
    %155 = vector.broadcast %154 : vector<16x1xf32> to vector<16x32xf32>
    %156 = arith.subf %146, %155 : vector<16x32xf32>
    %157 = arith.mulf %156, %156 : vector<16x32xf32>
    %cst_55 = arith.constant dense<0.000000e+00> : vector<16xf32>
    %158 = vector.multi_reduction <add>, %157, %cst_55 [1] : vector<16x32xf32> to vector<16xf32>
    %159 = vector.shape_cast %158 : vector<16xf32> to vector<16x1xf32>
    %cst_56 = arith.constant 3.200000e+01 : f32
    %160 = vector.broadcast %cst_56 : f32 to vector<16x1xf32>
    %161 = arith.divf %159, %160 : vector<16x1xf32>
    %162 = vector.broadcast %154 : vector<16x1xf32> to vector<16x32xf32>
    %163 = arith.subf %146, %162 : vector<16x32xf32>
    %cst_57 = arith.constant 9.99999974E-6 : f32
    %164 = vector.broadcast %cst_57 : f32 to vector<16x1xf32>
    %165 = arith.addf %161, %164 : vector<16x1xf32>
    %166 = math.rsqrt %165 : vector<16x1xf32>
    %167 = vector.broadcast %166 : vector<16x1xf32> to vector<16x32xf32>
    %168 = arith.mulf %163, %167 : vector<16x32xf32>
    %169 = vector.broadcast %148 : vector<1x32xf32> to vector<16x32xf32>
    %170 = arith.mulf %168, %169 : vector<16x32xf32>
    %171 = vector.broadcast %150 : vector<1x32xf32> to vector<16x32xf32>
    %172 = arith.addf %170, %171 : vector<16x32xf32>
    %173 = arith.truncf %172 : vector<16x32xf32> to vector<16x32xbf16>
    %c0_58 = arith.constant 0 : index
    %c0_59 = arith.constant 0 : index
    %c0_60 = arith.constant 0 : index
    %174 = vector.load %arg12[%c0_58, %c0_59, %c0_60] : memref<1x32x128xbf16, #tpu.memory_space<vmem>>, vector<1x32x128xbf16>
    %175 = vector.shape_cast %174 : vector<1x32x128xbf16> to vector<32x128xbf16>
    %cst_61 = arith.constant dense<0.000000e+00> : vector<16x128xf32>
    %176 = tpu.matmul %173, %175, %cst_61 {dimension_numbers = #tpu.dot_dimension_numbers<[1], [0], [0], [1], [0, 0, 1, 1], [], []>} : vector<16x32xbf16>, vector<32x128xbf16>, vector<16x128xf32> -> vector<16x128xf32>
    %c0_62 = arith.constant 0 : index
    %c0_63 = arith.constant 0 : index
    %c0_64 = arith.constant 0 : index
    %177 = vector.load %arg13[%c0_62, %c0_63, %c0_64] : memref<1x1x128xf32, #tpu.memory_space<vmem>>, vector<1x1x128xf32>
    %178 = vector.shape_cast %177 : vector<1x1x128xf32> to vector<1x128xf32>
    %179 = vector.broadcast %178 : vector<1x128xf32> to vector<16x128xf32>
    %180 = arith.addf %176, %179 : vector<16x128xf32>
    %181 = arith.mulf %180, %180 : vector<16x128xf32>
    %182 = arith.mulf %180, %181 : vector<16x128xf32>
    %cst_65 = arith.constant 4.471500e-02 : f32
    %183 = vector.broadcast %cst_65 : f32 to vector<16x128xf32>
    %184 = arith.mulf %183, %182 : vector<16x128xf32>
    %185 = arith.addf %180, %184 : vector<16x128xf32>
    %cst_66 = arith.constant 0.797884583 : f32
    %186 = vector.broadcast %cst_66 : f32 to vector<16x128xf32>
    %187 = arith.mulf %186, %185 : vector<16x128xf32>
    %188 = math.tanh %187 : vector<16x128xf32>
    %cst_67 = arith.constant 1.000000e+00 : f32
    %189 = vector.broadcast %cst_67 : f32 to vector<16x128xf32>
    %190 = arith.addf %189, %188 : vector<16x128xf32>
    %cst_68 = arith.constant 5.000000e-01 : f32
    %191 = vector.broadcast %cst_68 : f32 to vector<16x128xf32>
    %192 = arith.mulf %191, %190 : vector<16x128xf32>
    %193 = arith.mulf %180, %192 : vector<16x128xf32>
    %194 = arith.truncf %193 : vector<16x128xf32> to vector<16x128xbf16>
    %c0_69 = arith.constant 0 : index
    %c0_70 = arith.constant 0 : index
    %c0_71 = arith.constant 0 : index
    %195 = vector.load %arg14[%c0_69, %c0_70, %c0_71] : memref<1x128x32xbf16, #tpu.memory_space<vmem>>, vector<1x128x32xbf16>
    %196 = vector.shape_cast %195 : vector<1x128x32xbf16> to vector<128x32xbf16>
    %cst_72 = arith.constant dense<0.000000e+00> : vector<16x32xf32>
    %197 = tpu.matmul %194, %196, %cst_72 {dimension_numbers = #tpu.dot_dimension_numbers<[1], [0], [0], [1], [0, 0, 1, 1], [], []>} : vector<16x128xbf16>, vector<128x32xbf16>, vector<16x32xf32> -> vector<16x32xf32>
    %c0_73 = arith.constant 0 : index
    %c0_74 = arith.constant 0 : index
    %c0_75 = arith.constant 0 : index
    %198 = vector.load %arg15[%c0_73, %c0_74, %c0_75] : memref<1x1x32xf32, #tpu.memory_space<vmem>>, vector<1x1x32xf32>
    %199 = vector.shape_cast %198 : vector<1x1x32xf32> to vector<1x32xf32>
    %200 = vector.broadcast %199 : vector<1x32xf32> to vector<16x32xf32>
    %201 = arith.addf %197, %200 : vector<16x32xf32>
    %202 = arith.addf %146, %201 : vector<16x32xf32>
    %203 = arith.index_cast %arg1 : i32 to index
    %c0_76 = arith.constant 0 : index
    %c0_77 = arith.constant 0 : index
    %204 = vector.load %arg19[%203, %c0_76, %c0_77] : memref<2x16x32xf32, #tpu.memory_space<vmem>>, vector<1x16x32xf32>
    %205 = vector.shape_cast %204 : vector<1x16x32xf32> to vector<16x32xf32>
    %206 = vector.shape_cast %202 : vector<16x32xf32> to vector<1x16x32xf32>
    tpu.vector_store %arg19[%203, %c0_76, %c0_77], %206 {strides = array<i32>} : memref<2x16x32xf32, #tpu.memory_space<vmem>>, vector<1x16x32xf32>,
    %207 = vector.extract_strided_slice %202 {offsets = [0, 0], sizes = [1, 32], strides = [1, 1]} : vector<16x32xf32> to vector<1x32xf32>
    %c0_78 = arith.constant 0 : index
    %c0_79 = arith.constant 0 : index
    %208 = vector.load %arg16[%c0_78, %c0_79] : memref<1x32xf32, #tpu.memory_space<vmem>>, vector<1x32xf32>
    %c0_80 = arith.constant 0 : index
    %c0_81 = arith.constant 0 : index
    %209 = vector.load %arg17[%c0_80, %c0_81] : memref<1x32xf32, #tpu.memory_space<vmem>>, vector<1x32xf32>
    %cst_82 = arith.constant dense<0.000000e+00> : vector<1xf32>
    %210 = vector.multi_reduction <add>, %207, %cst_82 [1] : vector<1x32xf32> to vector<1xf32>
    %211 = vector.shape_cast %210 : vector<1xf32> to vector<1x1xf32>
    %cst_83 = arith.constant 3.200000e+01 : f32
    %212 = vector.broadcast %cst_83 : f32 to vector<1x1xf32>
    %213 = arith.divf %211, %212 : vector<1x1xf32>
    %214 = vector.broadcast %213 : vector<1x1xf32> to vector<1x32xf32>
    %215 = arith.subf %207, %214 : vector<1x32xf32>
    %216 = arith.mulf %215, %215 : vector<1x32xf32>
    %cst_84 = arith.constant dense<0.000000e+00> : vector<1xf32>
    %217 = vector.multi_reduction <add>, %216, %cst_84 [1] : vector<1x32xf32> to vector<1xf32>
    %218 = vector.shape_cast %217 : vector<1xf32> to vector<1x1xf32>
    %cst_85 = arith.constant 3.200000e+01 : f32
    %219 = vector.broadcast %cst_85 : f32 to vector<1x1xf32>
    %220 = arith.divf %218, %219 : vector<1x1xf32>
    %221 = vector.broadcast %213 : vector<1x1xf32> to vector<1x32xf32>
    %222 = arith.subf %207, %221 : vector<1x32xf32>
    %cst_86 = arith.constant 9.99999974E-6 : f32
    %223 = vector.broadcast %cst_86 : f32 to vector<1x1xf32>
    %224 = arith.addf %220, %223 : vector<1x1xf32>
    %225 = math.rsqrt %224 : vector<1x1xf32>
    %226 = vector.broadcast %225 : vector<1x1xf32> to vector<1x32xf32>
    %227 = arith.mulf %222, %226 : vector<1x32xf32>
    %228 = arith.mulf %227, %208 : vector<1x32xf32>
    %229 = arith.addf %228, %209 : vector<1x32xf32>
    %c0_87 = arith.constant 0 : index
    %c0_88 = arith.constant 0 : index
    %c0_89 = arith.constant 0 : index
    %230 = vector.load %arg18[%c0_87, %c0_88, %c0_89] : memref<1x1x32xf32, #tpu.memory_space<vmem>>, vector<1x1x32xf32>
    %231 = vector.shape_cast %230 : vector<1x1x32xf32> to vector<1x32xf32>
    %232 = vector.shape_cast %229 : vector<1x32xf32> to vector<1x1x32xf32>
    tpu.vector_store %arg18[%c0_87, %c0_88, %c0_89], %232 {strides = array<i32>} : memref<1x1x32xf32, #tpu.memory_space<vmem>>, vector<1x1x32xf32>,
    return
  }
  func.func @transform_0(%arg0: i32, %arg1: i32) -> (i32, i32, i32) {
    %c0_i32 = arith.constant 0 : i32
    %c0_i32_0 = arith.constant 0 : i32
    %c0_i32_1 = arith.constant 0 : i32
    return %arg1, %c0_i32, %c0_i32_0 : i32, i32, i32
  }
  func.func @transform_1(%arg0: i32, %arg1: i32) -> (i32, i32) {
    %c0_i32 = arith.constant 0 : i32
    %c0_i32_0 = arith.constant 0 : i32
    %c0_i32_1 = arith.constant 0 : i32
    return %c0_i32, %c0_i32_0 : i32, i32
  }
  func.func @transform_2(%arg0: i32, %arg1: i32) -> (i32, i32) {
    %c0_i32 = arith.constant 0 : i32
    %c0_i32_0 = arith.constant 0 : i32
    %c0_i32_1 = arith.constant 0 : i32
    return %c0_i32, %c0_i32_0 : i32, i32
  }
  func.func @transform_3(%arg0: i32, %arg1: i32) -> (i32, i32, i32) {
    %c0_i32 = arith.constant 0 : i32
    %c0_i32_0 = arith.constant 0 : i32
    %c0_i32_1 = arith.constant 0 : i32
    return %arg0, %c0_i32, %c0_i32_0 : i32, i32, i32
  }
  func.func @transform_4(%arg0: i32, %arg1: i32) -> (i32, i32, i32) {
    %c0_i32 = arith.constant 0 : i32
    %c0_i32_0 = arith.constant 0 : i32
    %c0_i32_1 = arith.constant 0 : i32
    return %arg0, %c0_i32, %c0_i32_0 : i32, i32, i32
  }
  func.func @transform_5(%arg0: i32, %arg1: i32) -> (i32, i32, i32) {
    %c0_i32 = arith.constant 0 : i32
    %c0_i32_0 = arith.constant 0 : i32
    %c0_i32_1 = arith.constant 0 : i32
    return %arg0, %c0_i32, %c0_i32_0 : i32, i32, i32
  }
  func.func @transform_6(%arg0: i32, %arg1: i32) -> (i32, i32, i32) {
    %c0_i32 = arith.constant 0 : i32
    %c0_i32_0 = arith.constant 0 : i32
    %c0_i32_1 = arith.constant 0 : i32
    return %arg0, %c0_i32, %c0_i32_0 : i32, i32, i32
  }
  func.func @transform_7(%arg0: i32, %arg1: i32) -> (i32, i32, i32) {
    %c0_i32 = arith.constant 0 : i32
    %c0_i32_0 = arith.constant 0 : i32
    %c0_i32_1 = arith.constant 0 : i32
    return %arg0, %c0_i32, %c0_i32_0 : i32, i32, i32
  }
  func.func @transform_8(%arg0: i32, %arg1: i32) -> (i32, i32, i32) {
    %c0_i32 = arith.constant 0 : i32
    %c0_i32_0 = arith.constant 0 : i32
    %c0_i32_1 = arith.constant 0 : i32
    return %arg0, %c0_i32, %c0_i32_0 : i32, i32, i32
  }
  func.func @transform_9(%arg0: i32, %arg1: i32) -> (i32, i32, i32) {
    %c0_i32 = arith.constant 0 : i32
    %c0_i32_0 = arith.constant 0 : i32
    %c0_i32_1 = arith.constant 0 : i32
    return %arg0, %c0_i32, %c0_i32_0 : i32, i32, i32
  }
  func.func @transform_10(%arg0: i32, %arg1: i32) -> (i32, i32, i32) {
    %c0_i32 = arith.constant 0 : i32
    %c0_i32_0 = arith.constant 0 : i32
    %c0_i32_1 = arith.constant 0 : i32
    return %arg0, %c0_i32, %c0_i32_0 : i32, i32, i32
  }
  func.func @transform_11(%arg0: i32, %arg1: i32) -> (i32, i32, i32) {
    %c0_i32 = arith.constant 0 : i32
    %c0_i32_0 = arith.constant 0 : i32
    %c0_i32_1 = arith.constant 0 : i32
    return %arg0, %c0_i32, %c0_i32_0 : i32, i32, i32
  }
  func.func @transform_12(%arg0: i32, %arg1: i32) -> (i32, i32, i32) {
    %c0_i32 = arith.constant 0 : i32
    %c0_i32_0 = arith.constant 0 : i32
    %c0_i32_1 = arith.constant 0 : i32
    return %arg0, %c0_i32, %c0_i32_0 : i32, i32, i32
  }
  func.func @transform_13(%arg0: i32, %arg1: i32) -> (i32, i32, i32) {
    %c0_i32 = arith.constant 0 : i32
    %c0_i32_0 = arith.constant 0 : i32
    %c0_i32_1 = arith.constant 0 : i32
    return %arg0, %c0_i32, %c0_i32_0 : i32, i32, i32
  }
  func.func @transform_14(%arg0: i32, %arg1: i32) -> (i32, i32) {
    %c0_i32 = arith.constant 0 : i32
    %c0_i32_0 = arith.constant 0 : i32
    %c0_i32_1 = arith.constant 0 : i32
    return %c0_i32, %c0_i32_0 : i32, i32
  }
  func.func @transform_15(%arg0: i32, %arg1: i32) -> (i32, i32) {
    %c0_i32 = arith.constant 0 : i32
    %c0_i32_0 = arith.constant 0 : i32
    %c0_i32_1 = arith.constant 0 : i32
    return %c0_i32, %c0_i32_0 : i32, i32
  }
  func.func @transform_16(%arg0: i32, %arg1: i32) -> (i32, i32, i32) {
    %c0_i32 = arith.constant 0 : i32
    %c0_i32_0 = arith.constant 0 : i32
    %c0_i32_1 = arith.constant 0 : i32
    return %arg1, %c0_i32, %c0_i32_0 : i32, i32, i32
  }
}

</mosaic_0001>

<bundles_post_ra>
// kernel: vit_forward.1
= control target key start
LH: loop header
LB: loop body
LE: loop exit
PB: predicated region body
PF: predicated region fallthrough
CT: control target
= control target key end

     0   :  { %s3111_s0 = inlined_call_operand.vmem [shape: bf16[2,16,192], index: 0, kind: input, shape index: {}]   ;;  %s3112_s1 = inlined_call_operand.vmem [shape: bf16[192,32], index: 1, kind: input, shape index: {}]   ;;  %s3113_s2 = inlined_call_operand.vmem [shape: f32[16,32], index: 2, kind: input, shape index: {}]   ;;  %s3114_s3 = inlined_call_operand.vmem [shape: f32[2,1,32], index: 3, kind: input, shape index: {}]   ;;  %s3115_s4 = inlined_call_operand.vmem [shape: f32[2,1,32], index: 4, kind: input, shape index: {}]   ;;  %s3116_s5 = inlined_call_operand.vmem [shape: bf16[2,32,96], index: 5, kind: input, shape index: {}]   ;;  %s3117_s6 = inlined_call_operand.vmem [shape: bf16[2,32,32], index: 6, kind: input, shape index: {}]   ;;  %s3118_s7 = inlined_call_operand.vmem [shape: f32[2,1,32], index: 7, kind: input, shape index: {}]   ;;  %s3119_s8 = inlined_call_operand.vmem [shape: f32[2,1,32], index: 8, kind: input, shape index: {}]   ;;  %s3120_s9 = inlined_call_operand.vmem [shape: f32[2,1,32], index: 9, kind: input, shape index: {}]   ;;  %s3121_s10 = inlined_call_operand.vmem [shape: bf16[2,32,128], index: 10, kind: input, shape index: {}]   ;;  %s3122_s11 = inlined_call_operand.vmem [shape: f32[2,1,128], index: 11, kind: input, shape index: {}]   ;;  %s3123_s12 = inlined_call_operand.vmem [shape: bf16[2,128,32], index: 12, kind: input, shape index: {}]   ;;  %s3124_s13 = inlined_call_operand.vmem [shape: f32[2,1,32], index: 13, kind: input, shape index: {}]   ;;  %s3125_s14 = inlined_call_operand.vmem [shape: f32[1,32], index: 14, kind: input, shape index: {}]   ;;  %s3126_s15 = inlined_call_operand.vmem [shape: f32[1,32], index: 15, kind: input, shape index: {}]   ;;  %s3127_s16 = inlined_call_operand.hbm [shape: f32[2,1,32], index: 16, kind: output, shape index: {}]  }
   0x1   :  { %3144 = sst [smem:[#allocation18_spill]] %s3111_s0 }
   0x2   :  { %3145 = sst [smem:[#allocation19_spill]] %s3112_s1 }
   0x3   :  { %3146 = sst [smem:[#allocation20_spill]] %s3113_s2 }
   0x4   :  { %3147 = sst [smem:[#allocation21_spill]] %s3116_s5 }
   0x5   :  { %3148 = sst [smem:[#allocation22_spill]] %s3117_s6 }
   0x6   :  { %3149 = sst [smem:[#allocation23_spill]] %s3125_s14 }
   0x7   :  { %3150 = sst [smem:[#allocation24_spill]] %s3126_s15 }
   0x8   :  { %3151 = sst [smem:[#allocation25_spill]] %s3127_s16 }
   0x9   :  { %21 = vsyncpa [#allocation4], 0 }
   0xa   :  { %23 = vsyncpa [#allocation4 + $0x1], 0  ;;  %s2657_s21 = smov 0   ;;  %s2659_s22 = smov 0  }
   0xb   :  { %s2661_s23 = smov 0   ;;  %s2663_s24 = smov 0  }
   0xc   :  { %s2665_s25 = smov 0   ;;  %s2667_s26 = smov 0  }
   0xd   :  { %s2669_s27 = smov 0   ;;  %s2671_s28 = smov 0  }
   0xe LB: > { %3152 = sst [smem:[#allocation6_spill]] %s2527_s21  ;;  %s2087_s29 = sadd.s32 4294967295, %s2555_s28   ;;  %s2555_s28 = sphi %s2671_s28, %s29_s28   ;;  %s2551_s27 = sphi %s2669_s27, %s3193_s27   ;;  %s2547_s26 = sphi %s2667_s26, %s3192_s26   ;;  %s2543_s25 = sphi %s2665_s25, %s3191_s25   ;;  %s2539_s24 = sphi %s2663_s24, %s3190_s24   ;;  %s2535_s23 = sphi %s2661_s23, %s3189_s23   ;;  %s2531_s22 = sphi %s2659_s22, %s3195_s22   ;;  %s2527_s21 = sphi %s2657_s21, %s3194_s21  }
   0xf   : > { %3153 = sst [smem:[#allocation7_spill]] %s2535_s23  ;;  %s2088_s30 = sadd.s32 4294967294, %s2555_s28  }
  0x10   : > { %3154 = sst [smem:[#allocation8_spill]] %s2539_s24  ;;  %s38_s0 = sadd.s32 1, %s2547_s26 }
  0x11   : > { %3155 = sst [smem:[#allocation9_spill]] %s2547_s26  ;;  %s41_s17 = sadd.s32 1, %s2551_s27 }
  0x12   : > { %3156 = sst [smem:[#allocation10_spill]] %s2551_s27  ;;  %p39_p0 = scmp.ge.s32.totalorder %s38_s0, 2 }
  0x13   : > { %3157 = sst [smem:[#allocation11_spill]] %s2555_s28  ;;  %s444_s18 = sadd.s32 1, %s2535_s23 }
  0x14   : > { %p454_p1 = scmp.ne.s32.totalorder %s2535_s23, %s2531_s22  ;;  %p455_p2 = scmp.eq.s32.totalorder %s2087_s29, 3 }
  0x15   : > { %s3197_s0 = smov (%p39_p0, %s38_s0), 0  ;;  %s3199_s17 = smov (!%p39_p0, %s41_s17), %s2551_s27 }
  0x16   : > { %3158 = sst [smem:[#allocation12_spill]] %s3197_s0  ;;  %s441_s19 = ssub.s32 %s2547_s26, %s3197_s0 }
  0x17   : > { %p2709_p3 = por %p455_p2, %p454_p1  ;;  %p43_p4 = scmp.ge.s32.totalorder %s3199_s17, 2 }
  0x18   : > { %p442_p5 = scmp.eq.s32.totalorder %s441_s19, 0  ;;  %p460_p6 = scmp.ne.s32.totalorder %s2531_s22, %s2527_s21 }
  0x19   : > { %s3159_s20 = scalar_select %p2709_p3, 1, 0 }
  0x1a   : > { %p461_p7 = scmp.eq.s32.totalorder %s2088_s30, 3  ;;  %s3201_s17 = smov (%p43_p4, %s3199_s17), 0 }
  0x1b   : > { %3160 = sst [smem:[#allocation13_spill]] %s3159_s20  ;;  %p2091_p9 = scmp.ge.s32.totalorder %s2555_s28, 1 }
  0x1c   : > { %3161 = sst [smem:[#allocation14_spill]] %s3201_s17  ;;  %p2720_p8 = por %p461_p7, %p460_p6 }
  0x1d   : > { %s2718_s16 = scalar_select %p442_p5, %s2535_s23, %s444_s18  }
  0x1e   : > { %s3163_s15 = scalar_select %p2720_p8, 1, 0 }
  0x1f   : > { %3162 = sst [smem:[#allocation15_spill]] %s2718_s16  ;;  %p573_p10 = scmp.lt.s32.totalorder %s2555_s28, 5 }
  0x20   : > { %3164 = sst [smem:[#allocation16_spill]] %s3163_s15 }
  0x21   : > { %p574_p11 = pnand %p2091_p9, %p573_p10 }
  0x23   : > { %577 = sbr.rel (%p574_p11) target bundleno = 3229 (0xc9d), region = 84 }
  0x2a   : > { %p663_p12 = scmp.lt.s32.totalorder %s2539_s24, 1  ;;  %p668_p13 = scmp.lt.s32.totalorder %s2543_s25, 1 }
  0x2b   : > { %s3165_s27 = sld [smem:[#allocation18_spill]]  ;;  %s3166_s5 = sld [smem:[#allocation21_spill]] }
  0x2c   : > { %s664_s30 = scalar_select %p663_p12, %s2539_s24, 1 }
  0x2d   : > { %s2731_s19 = scalar_select %p668_p13, %s2543_s25, 1 }
  0x2e   : > { %s2155_s18 = sshll.u32 %s664_s30, 4  ;;  %s3167_s6 = sld [smem:[#allocation22_spill]] }
  0x2f   : > { %s2156_s14 = sshll.u32 %s2731_s19, 4  ;;  %s689_s15 = scalar_lea.vmem %s3119_s8, %s2731_s19 }
  0x30   : > { %s708_s28 = scalar_lea.vmem %s3124_s13, %s2731_s19  ;;  %s3169_s21 = sand.u32 1, %s2531_s22  }
  0x31   : > { %s2736_s29 = scalar_lea.vmem %s3165_s27, %s2155_s18  ;;  %s2750_s24 = scalar_lea.vmem %s3166_s5, %s2156_s14 }
  0x32   : > { %s2772_s5 = scalar_lea.vmem %s3121_s10, %s2156_s14  ;;  %s2790_s23 = scalar_lea.vmem [#allocation3], %s3169_s21 }
  0x33   : > { %p2102_p0 = scmp.ne.s32.totalorder %s2543_s25, 0 }
  0x34   : > { %s2755_s0 = scalar_lea.vmem %s3167_s6, %s2156_s14  ;;  %s700_s6 = scalar_lea.vmem %s3122_s11, %s2731_s19  ;;  %v2557_v1 = vmov (!%p2102_p0), 0   ;;  %vm823_vm0 = vcmask (!%p2102_p0), 523264   ;;  %v2385_v5 = vld [vmem:[%s2736_s29 + $0x4] ss:$8 sps:$4 sm:$0xff] (!%p2102_p0)   ;;  %v2383_v14 = vld [vmem:[%s2736_s29] ss:$8 sps:$4 sm:$0xff] (!%p2102_p0)  }
  0x35   : > { %3168 = sst [smem:[#allocation17_spill]] %s2755_s0  ;;  %s2159_s0 = sshll.u32 %s2731_s19, 6  ;;  %827 = vmatprep.subr.bf16.mxu0 (!%p2102_p0), %v2557_v1  ;;  %2117 = vmatprep.mubr.msk.bf16.mxu0 (!%p2102_p0), %vm823_vm0, %v2385_v5  ;;  %vm870_vm1 = vcmask (!%p2102_p0), 261120  }
  0x36   : > { %s2782_s16 = scalar_lea.vmem %s3123_s12, %s2159_s0  ;;  %713 = sbr.rel (%p2102_p0) target bundleno = 326 (0x146), region = 88 }
  0x37   : > { %s3170_s20 = sld [smem:[#allocation19_spill]] (!%p2102_p0)  ;;  %s3171_s27 = sld [smem:[#allocation8_spill]] (!%p2102_p0) }
  0x38   : > { %s3172_s17 = sld [smem:[#allocation20_spill]] (!%p2102_p0) }
  0x3d   : > { %v2371_v0 = vld [vmem:[%s3170_s20] sm:$0xff]   ;;  %v2372_v2 = vld [vmem:[%s3170_s20 + $0x8] sm:$0xff]   ;;  %v2373_v3 = vld [vmem:[%s3170_s20 + $0x10] sm:$0xff]   ;;  %s2118_s1 = sshll.u32 %s3171_s27, 4 }
  0x3e   : > { %828 = vmatpush1.bf16.msra.mxu0 %v2371_v0  ;;  %v2374_v4 = vld [vmem:[%s3170_s20 + $0x18] sm:$0xff]   ;;  %v2375_v6 = vld [vmem:[%s3170_s20 + $0x20] sm:$0xff]   ;;  %v2376_v7 = vld [vmem:[%s3170_s20 + $0x28] sm:$0xff]   ;;  %s869_s21 = scalar_lea.vmem [#allocation2], %s2118_s1 }
  0x3f   : > { %829 = vmatprep.subr.bf16.mxu0 %v2557_v1  ;;  %v2377_v8 = vld [vmem:[%s3170_s20 + $0x30] sm:$0xff]   ;;  %v2378_v9 = vld [vmem:[%s3170_s20 + $0x38] sm:$0xff]   ;;  %v2379_v10 = vld [vmem:[%s3170_s20 + $0x40] sm:$0xff]  }
  0x40   : > { %v2380_v11 = vld [vmem:[%s3170_s20 + $0x48] sm:$0xff]   ;;  %v2381_v12 = vld [vmem:[%s3170_s20 + $0x50] sm:$0xff]   ;;  %v2382_v13 = vld [vmem:[%s3170_s20 + $0x58] sm:$0xff]  }
  0x41   : > { %v740_v15 = vld [vmem:[%s3172_s17] sm:$0xff]  ;;  %v741_v17 = vld [vmem:[%s3172_s17 + $0x8] sm:$0xff] }
  0x42   : > { %830 = vmatpush1.bf16.msra.mxu0 %v2372_v2 }
  0x43   : > { %831 = vmatprep.subr.bf16.mxu0 %v2557_v1 }
  0x46   : > { %832 = vmatpush1.bf16.msra.mxu0 %v2373_v3 }
  0x47   : > { %833 = vmatprep.subr.bf16.mxu0 %v2557_v1 }
  0x4a   : > { %834 = vmatpush1.bf16.msra.mxu0 %v2374_v4 }
  0x4b   : > { %835 = vmatprep.subr.bf16.mxu0 %v2557_v1 }
  0x4e   : > { %836 = vmatpush1.bf16.msra.mxu0 %v2375_v6 }
  0x4f   : > { %837 = vmatprep.subr.bf16.mxu0 %v2557_v1 }
  0x52   : > { %838 = vmatpush1.bf16.msra.mxu0 %v2376_v7 }
  0x53   : > { %839 = vmatprep.subr.bf16.mxu0 %v2557_v1 }
  0x56   : > { %840 = vmatpush1.bf16.msra.mxu0 %v2377_v8 }
  0x57   : > { %841 = vmatprep.subr.bf16.mxu0 %v2557_v1 }
  0x5a   : > { %842 = vmatpush1.bf16.msra.mxu0 %v2378_v9 }
  0x5b   : > { %843 = vmatprep.subr.bf16.mxu0 %v2557_v1 }
  0x5e   : > { %844 = vmatpush1.bf16.msra.mxu0 %v2379_v10 }
  0x5f   : > { %845 = vmatprep.subr.bf16.mxu0 %v2557_v1 }
  0x62   : > { %846 = vmatpush1.bf16.msra.mxu0 %v2380_v11 }
  0x63   : > { %847 = vmatprep.subr.bf16.mxu0 %v2557_v1 }
  0x66   : > { %848 = vmatpush1.bf16.msra.mxu0 %v2381_v12 }
  0x67   : > { %849 = vmatprep.subr.bf16.mxu0 %v2557_v1 }
  0x6a   : > { %850 = vmatpush1.bf16.msra.mxu0 %v2382_v13 }
  0x6d   : > { %860 = vmatmul.mubr.bf16.vlgmr.msra.gmra.mrb[0].mxu0 %v2383_v14 }
 0x140   : > { %v861_v16 = vpop.f32.mrb[0].mxu0 }
 0x141   : > { %v862_v18 = vadd.f32 %v861_v16, %v740_v15  ;;  %v863_v19 = vpop.f32.mrb[1].mxu0 }
 0x142   : > { %v864_v20 = vpop.f32.mrb[2].mxu0 }
 0x143   : > { %871 = vst.msk [vmem:[%s869_s21] sm:$0xff] %vm870_vm1, %v862_v18  ;;  %v865_v21 = vadd.f32 %v864_v20, %v741_v17  ;;  %v866_v22 = vpop.f32.mrb[3].mxu0 }
 0x145   : > { %872 = vst.msk [vmem:[%s869_s21 + $0x8] sm:$0xff] %vm870_vm1, %v865_v21 }
 0x146 PF: > { %s3173_s29 = sld [smem:[#allocation8_spill]]  ;;  %vm879_vm2 = vcmask 261120   ;;  %v2401_v37 = vld [vmem:[%s2750_s24] sm:$0xff]   ;;  %v2558_v38 = vmov 0.0   ;;  %v2402_v39 = vld [vmem:[%s2750_s24 + $0x8] sm:$0xff]   ;;  %vm2559_vm3 = vmmov 0   ;;  %s3174_s0 = scalar_lea.vmem %s3114_s3, %s2731_s19  ;;  %v1027_v18 = vlaneseq }
 0x147   : > { %2194 = vmatprep.subr.bf16.mxu1 %v2558_v38  ;;  %2214 = vmatprep.subr.bf16.mxu0 %v2558_v38  ;;  %v2120_v48 = vld [vmem:[%s3174_s0] ss:$0 sm:$0xff]  ;;  %s3175_s25 = scalar_lea.vmem %s3115_s4, %s2731_s19  ;;  %s2560_s26 = smov 96   ;;  %vm1037_vm4 = vcmask 1043456   ;;  %vm1033_vm5 = vcmask 64512   ;;  %vm1086_vm7 = vcmask 130048  }
 0x148   : > { %2195 = vmatpush3.bf16.msra.mxu1 %v2401_v37  ;;  %2198 = vmatprep.mubr.msk.bf16.mxu1 %vm2559_vm3, %v2558_v38  ;;  %v2121_v52 = vld [vmem:[%s3175_s25] ss:$0 sm:$0xff]  ;;  %s2561_s18 = smov 112   ;;  %s2562_s21 = smov 120   ;;  %v1028_v19 = vand.u32 127, %v1027_v18  ;;  %vm1554_vm8 = vcmask 195584  }
 0x149   : > { %2196 = vmatprep.subr.bf16.mxu1 %v2558_v38  ;;  %2216 = vmatprep.mubr.msk.bf16.mxu0 %vm2559_vm3, %v2558_v38  ;;  %s2563_s24 = smov 104   ;;  %s2564_s2 = smov 40   ;;  %vm1876_vm9 = vcmask 253952  }
 0x14a   : > { %vm1029_vm6 = vcmp.lt.s32.totalorder %v1028_v19, 5  ;;  %s2565_s0 = smov 64   ;;  %s2566_s1 = smov 56  }
 0x14b   : > { %s2567_s30 = smov 48   ;;  %s3176_s25 = sld [smem:[#allocation17_spill]] }
 0x14c   : > { %s2119_s27 = sshll.u32 %s3173_s29, 4  ;;  %2197 = vmatpush3.bf16.msra.mxu1 %v2402_v39  ;;  %s2571_s29 = smov [#allocation3]  }
 0x14d   : > { %s2841_s14 = scalar_lea.vmem [#allocation2], %s2119_s27  ;;  %2202 = vmatprep.subr.bf16.mxu1 %v2558_v38 }
 0x14e   : > { %v2844_v23 = vld [vmem:[%s2841_s14] sm:$0xff]  ;;  %v2847_v24 = vld [vmem:[%s2841_s14 + $0x8] sm:$0xff] }
 0x14f   : > { %v880_v25 = vsel %vm879_vm2, %v2844_v23, 0.0  ;;  %v883_v26 = vsel %vm879_vm2, %v2847_v24, 0.0 }
 0x150   : > { %881 = vadd.xlane.f32.xlu0 %v880_v25 }
 0x154   : > { %884 = vadd.xlane.f32.xlu0 %v883_v26 }
 0x1dd   : > { %v882_v27 = vpop.xlane.xlu0 %881 }
 0x1de   : > { %v887_v28 = vmul.f32 0.03125, %v882_v27 }
 0x1e0   : > { %v889_v29 = vsub.f32 %v2844_v23, %v887_v28 }
 0x1e1   : > { %v885_v30 = vpop.xlane.xlu0 %884 }
 0x1e2   : > { %v888_v31 = vmul.f32 0.03125, %v885_v30  ;;  %v891_v32 = vmul.f32 %v889_v29, %v889_v29 }
 0x1e4   : > { %v890_v33 = vsub.f32 %v2847_v24, %v888_v31  ;;  %v893_v34 = vsel %vm879_vm2, %v891_v32, 0.0 }
 0x1e5   : > { %894 = vadd.xlane.f32.xlu1 %v893_v34 }
 0x1e6   : > { %v892_v35 = vmul.f32 %v890_v33, %v890_v33 }
 0x1e8   : > { %v896_v36 = vsel %vm879_vm2, %v892_v35, 0.0 }
 0x1e9   : > { %897 = vadd.xlane.f32.xlu1 %v896_v36 }
 0x272   : > { %v895_v40 = vpop.xlane.xlu1 %894 }
 0x273   : > { %v899_v41 = vmul.f32 0.03125, %v895_v40 }
 0x275   : > { %v901_v42 = vadd.f32 1e-05, %v899_v41 }
 0x276   : > { %v898_v43 = vpop.xlane.xlu1 %897 }
 0x277   : > { %2415 = vrsqrt.f32 %v901_v42  ;;  %v900_v44 = vmul.f32 0.03125, %v898_v43 }
 0x279   : > { %v902_v45 = vadd.f32 1e-05, %v900_v44 }
 0x27b   : > { %2417 = vrsqrt.f32 %v902_v45 }
 0x281   : > { %v2416_v46 = vpop.eup %2415 }
 0x282   : > { %v905_v47 = vmul.f32 %v2416_v46, %v889_v29 }
 0x284   : > { %v913_v51 = vmul.f32 %v2120_v48, %v905_v47 }
 0x285   : > { %v2418_v49 = vpop.eup %2417 }
 0x286   : > { %v906_v50 = vmul.f32 %v2418_v49, %v890_v33  ;;  %v921_v54 = vadd.f32 %v2121_v52, %v913_v51 }
 0x288   : > { %v914_v53 = vmul.f32 %v2120_v48, %v906_v50 }
 0x28a   : > { %v922_v55 = vadd.f32 %v2121_v52, %v914_v53 }
 0x28c   : > { %v923_v56 = vpack.c.bf16 %v922_v55, %v921_v54 }
 0x28e   : > { %2199 = vmatmul.mubr.msk.bf16.vlgmr.msra.gmra.mrb[0].mxu1 %vm879_vm2, %v923_v56 }
 0x28f   : > { %2204 = vmatprep.mubr.msk.bf16.mxu1 %vm2559_vm3, %v2558_v38 }
 0x361   : > { %v977_v57 = vpop.f32.mrb[0].mxu1 }
 0x362   : > { %986 = vrot.lane.b32.xlu0 %v977_v57, %s2560_s26  ;;  %v2200_v58 = vpop.f32.mrb[1].mxu1  ;;  %v1030_v60 = vmul.f32 0.35355338, %v977_v57 }
 0x363   : > { %v980_v59 = vpop.f32.mrb[2].mxu1 }
 0x364   : > { %v2880_v61 = vpack.c.bf16 %v980_v59, %v977_v57  ;;  %v1031_v62 = vmul.f32 0.35355338, %v980_v59  ;;  %988 = vrot.lane.b32.xlu1 %v980_v59, %s2560_s26  ;;  %v2201_v63 = vpop.f32.mrb[3].mxu1  ;;  %s2568_s26 = smov 8  }
 0x366   : > { %v1032_v0 = vpack.c.bf16 %v1031_v62, %v1030_v60 }
 0x368   : > { %1282 = vrot.lane.b32.xlu0 %v1032_v0, %s2561_s18  ;;  %1159 = vrot.lane.b32.xlu1 %v1032_v0, %s2562_s21  ;;  %s2569_s18 = smov 16   ;;  %s2570_s21 = smov 24  }
 0x36c   : > { %1403 = vrot.lane.b32.xlu0 %v1032_v0, %s2563_s24  ;;  %s3180_s24 = sld [smem:[#allocation23_spill]] }
 0x3d4   : > { %v987_v1 = vpop.permute.xlu0 %986 }
 0x3d5   : > { %992 = vxpose.xlu1.b32.start [1/2] (short) (narrow) %v987_v1, 32 }
 0x3d6   : > { %v989_v2 = vpop.permute.xlu1 %988 }
 0x3d9   : > { %993 = vxpose.xlu1.b32.end [2/2] (short) (narrow) %v989_v2, 32 }
 0x3da   : > { %v1160_v3 = vpop.permute.xlu1 %1159  ;;  %v1283_v16 = vpop.permute.xlu0 %1282 }
 0x3de   : > { %v1404_v17 = vpop.permute.xlu0 %1403 }
 0x455   : > { %v1008_v4 = vpop.trf.xlu1 }
 0x459   : > { %v1009_v5 = vpop.trf.xlu1 }
 0x45a   : > { %v1024_v6 = vpack.c.bf16 %v1009_v5, %v1008_v4 }
 0x45c   : > { %v1039_v7 = vsel %vm1037_vm4, %v1024_v6, 0  ;;  %v1162_v8 = vrot.slane %v1024_v6, 4 }
 0x45d   : > { %2203 = vmatpush3.bf16.msra.mxu1 %v1039_v7  ;;  %v1010_v9 = vpop.trf.xlu1 }
 0x45e   : > { %v1167_v10 = vsel %vm1037_vm4, %v1162_v8, 0  ;;  %2208 = vmatprep.subr.bf16.mxu1 %v2558_v38 }
 0x45f   : > { %2215 = vmatpush3.bf16.msra.mxu0 %v1167_v10 }
 0x460   : > { %2205 = vmatmul.mubr.msk.bf16.vlgmr.msra.gmra.mrb[4].mxu1 %vm1033_vm5, %v1032_v0  ;;  %2226 = vmatprep.subr.bf16.mxu0 %v2558_v38 }
 0x461   : > { %v1011_v11 = vpop.trf.xlu1  ;;  %2210 = vmatprep.mubr.msk.bf16.mxu1 %vm2559_vm3, %v2558_v38 }
 0x462   : > { %2217 = vmatmul.mubr.msk.bf16.vlgmr.msra.gmra.mrb[0].mxu0 %vm1033_vm5, %v1160_v3  ;;  %v1025_v12 = vpack.c.bf16 %v1011_v11, %v1010_v9 }
 0x463   : > { %2228 = vmatprep.mubr.msk.bf16.mxu0 %vm2559_vm3, %v2558_v38 }
 0x464   : > { %v1288_v13 = vsel %vm1037_vm4, %v1025_v12, 0  ;;  %v1406_v14 = vrot.slane %v1025_v12, 4 }
 0x465   : > { %2227 = vmatpush3.bf16.msra.mxu0 %v1288_v13 }
 0x466   : > { %2238 = vmatprep.subr.bf16.mxu0 %v2558_v38  ;;  %v1411_v15 = vsel %vm1037_vm4, %v1406_v14, 0 }
 0x46a   : > { %2229 = vmatmul.mubr.msk.bf16.vlgmr.msra.gmra.mrb[4].mxu0 %vm1033_vm5, %v1283_v16 }
 0x46b   : > { %2239 = vmatpush3.bf16.msra.mxu0 %v1411_v15  ;;  %2240 = vmatprep.mubr.msk.bf16.mxu0 %vm2559_vm3, %v2558_v38 }
 0x46c   : > { %2250 = vmatprep.subr.bf16.mxu0 %v2558_v38 }
 0x472   : > { %2241 = vmatmul.mubr.msk.bf16.vlgmr.msra.gmra.mrb[8].mxu0 %vm1033_vm5, %v1404_v17 }
 0x473   : > { %2254 = vmatprep.mubr.msk.bf16.mxu0 %vm2559_vm3, %v2558_v38 }
 0x533   : > { %v1075_v20 = vpop.f32.mrb[4].mxu1 }
 0x534   : > { %v1084_v21 = vsel %vm1029_vm6, %v1075_v20, -1e+30  ;;  %v2206_v22 = vpop.f32.mrb[5].mxu1 }
 0x535   : > { %v1078_v25 = vpop.f32.mrb[6].mxu1  ;;  %v1203_v26 = vpop.f32.mrb[0].mxu0  ;;  %v1087_v27 = vsel %vm1086_vm7, %v1084_v21, -inf }
 0x536   : > { %v1085_v28 = vsel %vm1029_vm6, %v1078_v25, -1e+30  ;;  %v2218_v29 = vpop.f32.mrb[1].mxu0  ;;  %1088 = vmax.xlane.f32.xlu0 %v1087_v27  ;;  %v2207_v30 = vpop.f32.mrb[7].mxu1  ;;  %v1210_v36 = vsel %vm1029_vm6, %v1203_v26, -1e+30 }
 0x537   : > { %v1206_v31 = vpop.f32.mrb[2].mxu0  ;;  %v1090_v35 = vsel %vm1086_vm7, %v1085_v28, -inf  ;;  %v1212_v39 = vsel %vm1086_vm7, %v1210_v36, -inf }
 0x538   : > { %v1211_v32 = vsel %vm1029_vm6, %v1206_v31, -1e+30  ;;  %v2219_v33 = vpop.f32.mrb[3].mxu0 }
 0x539   : > { %v1215_v34 = vsel %vm1086_vm7, %v1211_v32, -inf }
 0x53a   : > { %1216 = vmax.xlane.f32.xlu1 %v1215_v34  ;;  %1091 = vmax.xlane.f32.xlu0 %v1090_v35 }
 0x53d   : > { %v1324_v37 = vpop.f32.mrb[4].mxu0 }
 0x53e   : > { %v2911_v40 = vsel %vm1029_vm6, %v1324_v37, -1e+30  ;;  %v2230_v41 = vpop.f32.mrb[5].mxu0  ;;  %1213 = vmax.xlane.f32.xlu0 %v1212_v39 }
 0x53f   : > { %v1327_v42 = vpop.f32.mrb[6].mxu0  ;;  %v1333_v51 = vsel %vm1086_vm7, %v2911_v40, -inf }
 0x540   : > { %v2914_v43 = vsel %vm1029_vm6, %v1327_v42, -1e+30  ;;  %v2231_v44 = vpop.f32.mrb[7].mxu0 }
 0x541   : > { %v1336_v52 = vsel %vm1086_vm7, %v2914_v43, -inf }
 0x545   : > { %v1447_v45 = vpop.f32.mrb[8].mxu0 }
 0x546   : > { %v2917_v46 = vsel %vm1029_vm6, %v1447_v45, -1e+30  ;;  %v2242_v47 = vpop.f32.mrb[9].mxu0 }
 0x547   : > { %v1450_v48 = vpop.f32.mrb[10].mxu0  ;;  %v1456_v53 = vsel %vm1086_vm7, %v2917_v46, -inf }
 0x548   : > { %v2920_v49 = vsel %vm1029_vm6, %v1450_v48, -1e+30  ;;  %v2243_v50 = vpop.f32.mrb[11].mxu0 }
 0x549   : > { %v1459_v54 = vsel %vm1086_vm7, %v2920_v49, -inf }
 0x54b   : > { %1475 = vrot.lane.b32.xlu1 %v2880_v61, %s2564_s2 }
 0x554   : > { %1107 = vrot.lane.b32.xlu0 %v2880_v61, %s2565_s0  ;;  %s3177_s0 = scalar_lea.vmem %s3118_s7, %s2731_s19 }
 0x558   : > { %1231 = vrot.lane.b32.xlu0 %v2880_v61, %s2566_s1  ;;  %s1906_s1 = sshll.u32 %s2790_s23, 4  ;;  %s3056_s1 = int_to_ptr.vmem [resolvable:$true] %s1906_s1 }
 0x577   : > { %1334 = vmax.xlane.f32.xlu0 %v1333_v51 }
 0x57b   : > { %1337 = vmax.xlane.f32.xlu0 %v1336_v52 }
 0x57f   : > { %1457 = vmax.xlane.f32.xlu0 %v1456_v53 }
 0x583   : > { %1460 = vmax.xlane.f32.xlu0 %v1459_v54 }
 0x599   : > { %1352 = vrot.lane.b32.xlu0 %v2880_v61, %s2567_s30 }
 0x5c3   : > { %v1089_v55 = vpop.xlane.xlu0 %1088 }
 0x5c4   : > { %v1093_v56 = vsub.f32 %v1084_v21, %v1089_v55 }
 0x5c6   : > { %v1095_v57 = vmul.f32 1.442695, %v1093_v56 }
 0x5c7   : > { %v1217_v58 = vpop.xlane.xlu1 %1216  ;;  %v1092_v59 = vpop.xlane.xlu0 %1091 }
 0x5c8   : > { %v1219_v60 = vsub.f32 %v1211_v32, %v1217_v58  ;;  %v1094_v62 = vsub.f32 %v1085_v28, %v1092_v59  ;;  %2419 = vpow2.f32 %v1095_v57 }
 0x5ca   : > { %v1222_v63 = vmul.f32 1.442695, %v1219_v60  ;;  %v1097_v0 = vmul.f32 1.442695, %v1094_v62  ;;  %v2403_v60 = vld [vmem:[%s3176_s25] sm:$0xff]  }
 0x5cb   : > { %v1214_v1 = vpop.xlane.xlu0 %1213  ;;  %v1476_v33 = vpop.permute.xlu1 %1475  ;;  %2251 = vmatpush3.bf16.msra.mxu0 %v2403_v60 }
 0x5cc   : > { %2421 = vpow2.f32 %v1222_v63  ;;  %v1218_v2 = vsub.f32 %v1210_v36, %v1214_v1  ;;  %2252 = vmatprep.subr.bf16.mxu0 %v2558_v38 }
 0x5cd   : > { %2423 = vpow2.f32 %v1097_v0 }
 0x5ce   : > { %v1220_v3 = vmul.f32 1.442695, %v1218_v2 }
 0x5cf   : > { %v1108_v4 = vpop.permute.xlu0 %1107 }
 0x5d0   : > { %2425 = vpow2.f32 %v1220_v3  ;;  %2209 = vmatpush3.bf16.msra.mxu1 %v1108_v4 }
 0x5d1   : > { %2220 = vmatprep.subr.bf16.mxu1 %v2558_v38 }
 0x5d2   : > { %v2420_v61 = vpop.eup %2419 }
 0x5d3   : > { %v1232_v10 = vpop.permute.xlu0 %1231 }
 0x5d6   : > { %v2422_v5 = vpop.eup %2421 }
 0x5d7   : > { %v2424_v6 = vpop.eup %2423  ;;  %v1227_v7 = vsel %vm1086_vm7, %v2422_v5, 0.0 }
 0x5d8   : > { %1228 = vadd.xlane.f32.xlu1 %v1227_v7  ;;  %v1105_v8 = vpack.c.bf16 %v2424_v6, %v2420_v61  ;;  %v1102_v41 = vsel %vm1086_vm7, %v2424_v6, 0.0  ;;  %v2404_v6 = vld [vmem:[%s3176_s25 + $0x8] sm:$0xff]   ;;  %s3182_s25 = sld [smem:[#allocation25_spill]] }
 0x5d9   : > { %2253 = vmatpush3.bf16.msra.mxu0 %v2404_v6  ;;  %v2137_v6 = vld [vmem:[%s689_s15] ss:$0 sm:$0xff] }
 0x5da   : > { %v2426_v9 = vpop.eup %2425  ;;  %2211 = vmatmul.mubr.msk.bf16.vlgmr.msra.gmra.mrb[8].mxu1 %vm1086_vm7, %v1105_v8  ;;  %2266 = vmatprep.subr.bf16.mxu0 %v2558_v38 }
 0x5db   : > { %2221 = vmatpush3.bf16.msra.mxu1 %v1232_v10  ;;  %v1224_v11 = vsel %vm1086_vm7, %v2426_v9, 0.0  ;;  %2222 = vmatprep.mubr.msk.bf16.mxu1 %vm2559_vm3, %v2558_v38  ;;  %v1230_v12 = vpack.c.bf16 %v2422_v5, %v2426_v9 }
 0x5dc   : > { %1225 = vadd.xlane.f32.xlu0 %v1224_v11  ;;  %2232 = vmatprep.subr.bf16.mxu1 %v2558_v38 }
 0x5de   : > { %s3183_s15 = smov %s3182_s25 }
 0x5e2   : > { %2223 = vmatmul.mubr.msk.bf16.vlgmr.msra.gmra.mrb[12].mxu1 %vm1086_vm7, %v1230_v12 }
 0x5e3   : > { %2234 = vmatprep.mubr.msk.bf16.mxu1 %vm2559_vm3, %v2558_v38 }
 0x604   : > { %v1335_v13 = vpop.xlane.xlu0 %1334 }
 0x605   : > { %v1339_v14 = vsub.f32 %v2911_v40, %v1335_v13  ;;  %v1099_v40 = vsel %vm1086_vm7, %v2420_v61, 0.0 }
 0x607   : > { %v1341_v15 = vmul.f32 1.442695, %v1339_v14 }
 0x608   : > { %v1338_v16 = vpop.xlane.xlu0 %1337 }
 0x609   : > { %2427 = vpow2.f32 %v1341_v15  ;;  %v1340_v17 = vsub.f32 %v2914_v43, %v1338_v16 }
 0x60b   : > { %v1343_v18 = vmul.f32 1.442695, %v1340_v17 }
 0x60c   : > { %v1458_v19 = vpop.xlane.xlu0 %1457 }
 0x60d   : > { %2429 = vpow2.f32 %v1343_v18  ;;  %v1462_v20 = vsub.f32 %v2917_v46, %v1458_v19 }
 0x60f   : > { %v1464_v21 = vmul.f32 1.442695, %v1462_v20 }
 0x610   : > { %v1461_v22 = vpop.xlane.xlu0 %1460 }
 0x611   : > { %2431 = vpow2.f32 %v1464_v21  ;;  %v1463_v25 = vsub.f32 %v2920_v49, %v1461_v22 }
 0x613   : > { %v2428_v26 = vpop.eup %2427  ;;  %v1466_v27 = vmul.f32 1.442695, %v1463_v25 }
 0x614   : > { %v1353_v28 = vpop.permute.xlu0 %1352  ;;  %v1345_v29 = vsel %vm1086_vm7, %v2428_v26, 0.0 }
 0x615   : > { %2433 = vpow2.f32 %v1466_v27  ;;  %1346 = vadd.xlane.f32.xlu0 %v1345_v29  ;;  %2233 = vmatpush3.bf16.msra.mxu1 %v1353_v28 }
 0x616   : > { %2244 = vmatprep.subr.bf16.mxu1 %v2558_v38 }
 0x617   : > { %v2430_v30 = vpop.eup %2429 }
 0x618   : > { %v1348_v31 = vsel %vm1086_vm7, %v2430_v30, 0.0  ;;  %v1351_v32 = vpack.c.bf16 %v2430_v30, %v2428_v26 }
 0x619   : > { %1349 = vadd.xlane.f32.xlu0 %v1348_v31 }
 0x61a   : > { %2235 = vmatmul.mubr.msk.bf16.vlgmr.msra.gmra.mrb[16].mxu1 %vm1086_vm7, %v1351_v32 }
 0x61b   : > { %v2432_v34 = vpop.eup %2431  ;;  %2245 = vmatpush3.bf16.msra.mxu1 %v1476_v33  ;;  %2246 = vmatprep.mubr.msk.bf16.mxu1 %vm2559_vm3, %v2558_v38 }
 0x61c   : > { %v1468_v35 = vsel %vm1086_vm7, %v2432_v34, 0.0  ;;  %2258 = vmatprep.subr.bf16.mxu1 %v2558_v38 }
 0x61d   : > { %1469 = vadd.xlane.f32.xlu0 %v1468_v35 }
 0x61f   : > { %v2434_v36 = vpop.eup %2433 }
 0x620   : > { %v1471_v37 = vsel %vm1086_vm7, %v2434_v36, 0.0  ;;  %v1474_v39 = vpack.c.bf16 %v2434_v36, %v2432_v34 }
 0x621   : > { %1472 = vadd.xlane.f32.xlu0 %v1471_v37 }
 0x622   : > { %2247 = vmatmul.mubr.msk.bf16.vlgmr.msra.gmra.mrb[20].mxu1 %vm1086_vm7, %v1474_v39 }
 0x623   : > { %2262 = vmatprep.mubr.msk.bf16.mxu1 %vm2559_vm3, %v2558_v38 }
 0x625   : > { %1100 = vadd.xlane.f32.xlu0 %v1099_v40 }
 0x629   : > { %1103 = vadd.xlane.f32.xlu0 %v1102_v41 }
 0x665   : > { %v1229_v42 = vpop.xlane.xlu1 %1228 }
 0x666   : > { %2435 = vrcp.f32 %v1229_v42  ;;  %v2133_v42 = vld [vmem:[%s3177_s0] ss:$0 sm:$0xff]  ;;  %s3181_s0 = sld [smem:[#allocation24_spill]] }
 0x669   : > { %v1226_v43 = vpop.xlane.xlu0 %1225 }
 0x66a   : > { %2437 = vrcp.f32 %v1226_v43 }
 0x670   : > { %v2436_v49 = vpop.eup %2435 }
 0x674   : > { %v2438_v51 = vpop.eup %2437 }
 0x6a2   : > { %v1347_v57 = vpop.xlane.xlu0 %1346 }
 0x6a3   : > { %2439 = vrcp.f32 %v1347_v57 }
 0x6a6   : > { %v1350_v58 = vpop.xlane.xlu0 %1349 }
 0x6a7   : > { %2441 = vrcp.f32 %v1350_v58 }
 0x6aa   : > { %v1470_v59 = vpop.xlane.xlu0 %1469 }
 0x6ab   : > { %2443 = vrcp.f32 %v1470_v59 }
 0x6ad   : > { %v2962_v44 = vpop.f32.mrb[8].mxu1  ;;  %v2440_v0 = vpop.eup %2439 }
 0x6ae   : > { %v2212_v45 = vpop.f32.mrb[9].mxu1  ;;  %v1473_v62 = vpop.xlane.xlu0 %1472 }
 0x6af   : > { %v1150_v46 = vpop.f32.mrb[10].mxu1  ;;  %2445 = vrcp.f32 %v1473_v62  ;;  %v2405_v62 = vld [vmem:[%s2772_s5] sm:$0xff]  }
 0x6b0   : > { %v2213_v47 = vpop.f32.mrb[11].mxu1  ;;  %2259 = vmatpush3.bf16.msra.mxu1 %v2405_v62 }
 0x6b1   : > { %v2442_v2 = vpop.eup %2441  ;;  %2260 = vmatprep.subr.bf16.mxu1 %v2558_v38 }
 0x6b2   : > { %v1101_v17 = vpop.xlane.xlu0 %1100 }
 0x6b3   : > { %2447 = vrcp.f32 %v1101_v17  ;;  %v2408_v17 = vld [vmem:[%s2782_s16 + $0x8] sm:$0xff]  }
 0x6b5   : > { %v1271_v48 = vpop.f32.mrb[12].mxu1  ;;  %v2444_v9 = vpop.eup %2443 }
 0x6b6   : > { %v2224_v50 = vpop.f32.mrb[13].mxu1  ;;  %v1280_v53 = vmul.f32 %v2438_v51, %v1271_v48  ;;  %v1104_v18 = vpop.xlane.xlu0 %1103 }
 0x6b7   : > { %v1274_v52 = vpop.f32.mrb[14].mxu1  ;;  %2449 = vrcp.f32 %v1104_v18  ;;  %v2409_v18 = vld [vmem:[%s2782_s16 + $0x10] sm:$0xff]  }
 0x6b8   : > { %v1281_v54 = vmul.f32 %v2436_v49, %v1274_v52  ;;  %v2225_v55 = vpop.f32.mrb[15].mxu1 }
 0x6b9   : > { %v2446_v11 = vpop.eup %2445 }
 0x6ba   : > { %v2386_v56 = vpack.i.bf16 %v1281_v54, %v1280_v53 }
 0x6bc   : > { %2387 = vrot.lane.b32.xlu1 %v2386_v56, %s2568_s26  ;;  %s3178_s26 = scalar_lea.vmem %s3120_s9, %s2731_s19 }
 0x6bd   : > { %v2448_v20 = vpop.eup %2447 }
 0x6be   : > { %v1156_v29 = vmul.f32 %v2448_v20, %v2962_v44  ;;  %v2411_v20 = vld [vmem:[%s2782_s16 + $0x20] sm:$0xff]  }
 0x6c1   : > { %v2450_v22 = vpop.eup %2449 }
 0x6c2   : > { %v1157_v30 = vmul.f32 %v2450_v22, %v1150_v46  ;;  %v2413_v22 = vld [vmem:[%s2782_s16 + $0x30] sm:$0xff]  }
 0x6ed   : > { %v1392_v63 = vpop.f32.mrb[16].mxu1 }
 0x6ee   : > { %v2236_v1 = vpop.f32.mrb[17].mxu1  ;;  %v1401_v4 = vmul.f32 %v2440_v0, %v1392_v63  ;;  %v2406_v63 = vld [vmem:[%s2772_s5 + $0x8] sm:$0xff]  }
 0x6ef   : > { %v1395_v3 = vpop.f32.mrb[18].mxu1  ;;  %2261 = vmatpush3.bf16.msra.mxu1 %v2406_v63 }
 0x6f0   : > { %v1402_v61 = vmul.f32 %v2442_v2, %v1395_v3  ;;  %v2237_v5 = vpop.f32.mrb[19].mxu1 }
 0x6f2   : > { %v2391_v7 = vpack.i.bf16 %v1402_v61, %v1401_v4 }
 0x6f4   : > { %2392 = vrot.lane.b32.xlu0 %v2391_v7, %s2569_s18  ;;  %s3184_s18 = sand.u32 1, %s2531_s22  }
 0x6f5   : > { %v1515_v8 = vpop.f32.mrb[20].mxu1 }
 0x6f6   : > { %v2248_v10 = vpop.f32.mrb[21].mxu1  ;;  %v1524_v13 = vmul.f32 %v2444_v9, %v1515_v8 }
 0x6f7   : > { %v1518_v12 = vpop.f32.mrb[22].mxu1 }
 0x6f8   : > { %v1525_v14 = vmul.f32 %v2446_v11, %v1518_v12  ;;  %v2249_v15 = vpop.f32.mrb[23].mxu1  ;;  %v2138_v11 = vld [vmem:[%s3178_s26] ss:$0 sm:$0xff]  ;;  %s3054_s26 = scalar_lea.hbm %s3182_s25, %s2119_s27 }
 0x6fa   : > { %v2396_v16 = vpack.i.bf16 %v1525_v14, %v1524_v13 }
 0x6fc   : > { %2397 = vrot.lane.b32.xlu1 %v2396_v16, %s2570_s21  ;;  %v2407_v16 = vld [vmem:[%s2782_s16] sm:$0xff]  }
 0x72e   : > { %v2388_v19 = vpop.permute.xlu1 %2387 }
 0x72f   : > { %v2390_v25 = vunpack.i.h.bf16 %v2388_v19  ;;  %v2389_v26 = vunpack.i.l.bf16 %v2388_v19  ;;  %v2410_v19 = vld [vmem:[%s2782_s16 + $0x18] sm:$0xff]  }
 0x731   : > { %v1551_v32 = vsel %vm1033_vm5, %v1157_v30, %v2390_v25  ;;  %v1550_v33 = vsel %vm1033_vm5, %v1156_v29, %v2389_v26  ;;  %v2414_v25 = vld [vmem:[%s2782_s16 + $0x38] sm:$0xff]   ;;  %v2139_v26 = vld [vmem:[%s700_s6] ss:$0 sm:$0xff]  ;;  %s1894_s6 = scalar_lea.sflag [#allocation4], %s3184_s18 }
 0x766   : > { %v2393_v21 = vpop.permute.xlu0 %2392 }
 0x767   : > { %v2395_v27 = vunpack.i.h.bf16 %v2393_v21  ;;  %v2394_v28 = vunpack.i.l.bf16 %v2393_v21  ;;  %v2412_v21 = vld [vmem:[%s2782_s16 + $0x28] sm:$0xff]   ;;  %s2461_s16 = scalar_lea.vmem %s3056_s1, 16 }
 0x768   : > { %p2462_p1 = scmp.ne.s32.totalorder %s3056_s1, %s2461_s16 }
 0x769   : > { %v1553_v36 = vsel %vm1086_vm7, %v1551_v32, %v2395_v27  ;;  %v1552_v37 = vsel %vm1086_vm7, %v1550_v33, %v2394_v28 }
 0x76a   : > { %p2463_p2 = pnand %p2462_p1, %p2709_p3 }
 0x76c   : > { %p2464_p4 = pneg %p2463_p2 }
 0x76e   : > { %v2398_v31 = vpop.permute.xlu1 %2397 }
 0x76f   : > { %v2400_v34 = vunpack.i.h.bf16 %v2398_v31  ;;  %v2399_v35 = vunpack.i.l.bf16 %v2398_v31 }
 0x771   : > { %v1556_v39 = vsel %vm1554_vm8, %v1553_v36, %v2400_v34  ;;  %v1555_v40 = vsel %vm1554_vm8, %v1552_v37, %v2399_v35 }
 0x772   : > { %v1557_v41 = vpack.c.bf16 %v1556_v39, %v1555_v40 }
 0x774   : > { %2255 = vmatmul.mubr.msk.bf16.vlgmr.msra.gmra.mrb[12].mxu0 %vm879_vm2, %v1557_v41 }
 0x775   : > { %2282 = vmatprep.mubr.msk.bf16.mxu0 %vm2559_vm3, %v2558_v38  ;;  %2267 = vmatpush3.bf16.msra.mxu0 %v2407_v16 }
 0x776   : > { %2268 = vmatprep.subr.bf16.mxu0 %v2558_v38 }
 0x779   : > { %2269 = vmatpush3.bf16.msra.mxu0 %v2408_v17 }
 0x77a   : > { %2270 = vmatprep.subr.bf16.mxu0 %v2558_v38 }
 0x77d   : > { %2271 = vmatpush3.bf16.msra.mxu0 %v2409_v18 }
 0x77e   : > { %2272 = vmatprep.subr.bf16.mxu0 %v2558_v38 }
 0x781   : > { %2273 = vmatpush3.bf16.msra.mxu0 %v2410_v19 }
 0x782   : > { %2274 = vmatprep.subr.bf16.mxu0 %v2558_v38 }
 0x785   : > { %2275 = vmatpush3.bf16.msra.mxu0 %v2411_v20 }
 0x786   : > { %2276 = vmatprep.subr.bf16.mxu0 %v2558_v38 }
 0x789   : > { %2277 = vmatpush3.bf16.msra.mxu0 %v2412_v21 }
 0x78a   : > { %2278 = vmatprep.subr.bf16.mxu0 %v2558_v38 }
 0x78d   : > { %2279 = vmatpush3.bf16.msra.mxu0 %v2413_v22 }
 0x78e   : > { %2280 = vmatprep.subr.bf16.mxu0 %v2558_v38 }
 0x791   : > { %2281 = vmatpush3.bf16.msra.mxu0 %v2414_v25 }
 0x847   : > { %v1618_v43 = vpop.f32.mrb[12].mxu0 }
 0x848   : > { %v1619_v44 = vadd.f32 %v2133_v42, %v1618_v43  ;;  %v2256_v45 = vpop.f32.mrb[13].mxu0 }
 0x849   : > { %v1621_v46 = vpop.f32.mrb[14].mxu0 }
 0x84a   : > { %v2982_v47 = vadd.f32 %v1619_v44, %v2844_v23  ;;  %v1622_v48 = vadd.f32 %v2133_v42, %v1621_v46  ;;  %v2257_v49 = vpop.f32.mrb[15].mxu0 }
 0x84c   : > { %v2985_v50 = vadd.f32 %v1622_v48, %v2847_v24  ;;  %v1629_v51 = vsel %vm879_vm2, %v2982_v47, 0.0 }
 0x84d   : > { %1630 = vadd.xlane.f32.xlu1 %v1629_v51 }
 0x84e   : > { %v1632_v52 = vsel %vm879_vm2, %v2985_v50, 0.0 }
 0x84f   : > { %1633 = vadd.xlane.f32.xlu0 %v1632_v52 }
 0x8da   : > { %v1631_v53 = vpop.xlane.xlu1 %1630 }
 0x8db   : > { %v1635_v54 = vmul.f32 0.03125, %v1631_v53 }
 0x8dc   : > { %v1634_v55 = vpop.xlane.xlu0 %1633 }
 0x8dd   : > { %v1637_v23 = vsub.f32 %v2982_v47, %v1635_v54  ;;  %v1636_v56 = vmul.f32 0.03125, %v1634_v55  ;;  %v2143_v54 = vld [vmem:[%s708_s28] ss:$0 sm:$0xff]  ;;  %s2465_s28 = sshll.u32 %s2571_s29, 4  ;;  %s2466_s28 = int_to_ptr.vmem [resolvable:$false] %s2465_s28 }
 0x8de   : > { %s2467_s21 = scalar_lea.vmem %s2466_s28, 32  ;;  %p2468_p5 = scmp.lt.s32.totalorder %s3056_s1, %s2466_s28 }
 0x8df   : > { %v1638_v57 = vsub.f32 %v2985_v50, %v1636_v56  ;;  %v1639_v24 = vmul.f32 %v1637_v23, %v1637_v23  ;;  %p2469_p6 = scmp.lt.s32.totalorder %s2467_s21, %s2461_s16 }
 0x8e1   : > { %v1641_v58 = vsel %vm879_vm2, %v1639_v24, 0.0  ;;  %v1640_v59 = vmul.f32 %v1638_v57, %v1638_v57  ;;  %p2470_p7 = por %p2469_p6, %p2468_p5 }
 0x8e2   : > { %1642 = vadd.xlane.f32.xlu0 %v1641_v58 }
 0x8e3   : > { %v1644_v60 = vsel %vm879_vm2, %v1640_v59, 0.0  ;;  %p2471_p9 = pnand %p2470_p7, %p2464_p4 }
 0x8e4   : > { %1645 = vadd.xlane.f32.xlu1 %v1644_v60 }
 0x96f   : > { %v1643_v0 = vpop.xlane.xlu0 %1642 }
 0x970   : > { %v1647_v1 = vmul.f32 0.03125, %v1643_v0 }
 0x971   : > { %v1646_v2 = vpop.xlane.xlu1 %1645 }
 0x972   : > { %v1649_v3 = vadd.f32 1e-05, %v1647_v1  ;;  %v1648_v4 = vmul.f32 0.03125, %v1646_v2 }
 0x974   : > { %2451 = vrsqrt.f32 %v1649_v3  ;;  %v1650_v61 = vadd.f32 1e-05, %v1648_v4 }
 0x976   : > { %2453 = vrsqrt.f32 %v1650_v61 }
 0x97e   : > { %v2452_v5 = vpop.eup %2451 }
 0x97f   : > { %v1653_v7 = vmul.f32 %v2452_v5, %v1637_v23  ;;  %v1874_v5 = vld [vmem:[%s3180_s24] sm:$0x1] }
 0x980   : > { %v2454_v8 = vpop.eup %2453 }
 0x981   : > { %v1661_v9 = vmul.f32 %v2137_v6, %v1653_v7  ;;  %v1654_v10 = vmul.f32 %v2454_v8, %v1638_v57  ;;  %v1875_v7 = vld [vmem:[%s3181_s0] sm:$0x1] }
 0x983   : > { %v1662_v12 = vmul.f32 %v2137_v6, %v1654_v10  ;;  %v1669_v13 = vadd.f32 %v2138_v11, %v1661_v9 }
 0x985   : > { %v1670_v14 = vadd.f32 %v2138_v11, %v1662_v12 }
 0x987   : > { %v1671_v15 = vpack.c.bf16 %v1670_v14, %v1669_v13 }
 0x989   : > { %2263 = vmatmul.mubr.msk.bf16.vlgmr.msra.gmra.mrb[24].mxu1 %vm879_vm2, %v1671_v15 }
 0xa5c   : > { %v1732_v27 = vpop.f32.mrb[24].mxu1 }
 0xa5d   : > { %v1733_v28 = vadd.f32 %v2139_v26, %v1732_v27  ;;  %v2264_v29 = vpop.f32.mrb[25].mxu1 }
 0xa5e   : > { %v1735_v30 = vpop.f32.mrb[26].mxu1 }
 0xa5f   : > { %v1739_v31 = vmul.f32 %v1733_v28, %v1733_v28  ;;  %v1736_v32 = vadd.f32 %v2139_v26, %v1735_v30  ;;  %v2265_v33 = vpop.f32.mrb[27].mxu1 }
 0xa61   : > { %v1741_v34 = vmul.f32 %v1739_v31, %v1733_v28  ;;  %v1740_v35 = vmul.f32 %v1736_v32, %v1736_v32 }
 0xa63   : > { %v1743_v36 = vmul.f32 0.044715, %v1741_v34  ;;  %v1742_v37 = vmul.f32 %v1740_v35, %v1736_v32 }
 0xa65   : > { %v1745_v39 = vadd.f32 %v1743_v36, %v1733_v28  ;;  %v1744_v38 = vmul.f32 0.044715, %v1742_v37 }
 0xa67   : > { %v1747_v40 = vmul.f32 0.7978846, %v1745_v39  ;;  %v1746_v41 = vadd.f32 %v1744_v38, %v1736_v32 }
 0xa69   : > { %2455 = vtanh.f32 %v1747_v40  ;;  %v1748_v42 = vmul.f32 0.7978846, %v1746_v41 }
 0xa6b   : > { %2457 = vtanh.f32 %v1748_v42 }
 0xa73   : > { %v2456_v43 = vpop.eup %2455 }
 0xa74   : > { %v1751_v44 = vadd.f32 1.0, %v2456_v43 }
 0xa75   : > { %v2458_v45 = vpop.eup %2457 }
 0xa76   : > { %v1753_v46 = vmul.f32 0.5, %v1751_v44  ;;  %v1752_v48 = vadd.f32 1.0, %v2458_v45 }
 0xa78   : > { %v1754_v49 = vmul.f32 0.5, %v1752_v48  ;;  %v1755_v51 = vmul.f32 %v1753_v46, %v1733_v28 }
 0xa7a   : > { %v1756_v52 = vmul.f32 %v1754_v49, %v1736_v32 }
 0xa7c   : > { %v1757_v53 = vpack.c.bf16 %v1756_v52, %v1755_v51 }
 0xa7e   : > { %2283 = vmatmul.mubr.bf16.vlgmr.msra.gmra.mrb[16].mxu0 %v1757_v53 }
 0xb51   : > { %v1863_v55 = vpop.f32.mrb[16].mxu0 }
 0xb52   : > { %v1864_v23 = vadd.f32 %v2143_v54, %v1863_v55  ;;  %v2284_v56 = vpop.f32.mrb[17].mxu0 }
 0xb53   : > { %v1866_v57 = vpop.f32.mrb[18].mxu0 }
 0xb54   : > { %v1870_v24 = vadd.f32 %v1864_v23, %v2982_v47  ;;  %v1867_v58 = vadd.f32 %v2143_v54, %v1866_v57  ;;  %v2285_v59 = vpop.f32.mrb[19].mxu0 }
 0xb56   : > { %1872 = vst.msk [vmem:[%s2841_s14] sm:$0xff] %vm879_vm2, %v1870_v24  ;;  %v1871_v60 = vadd.f32 %v1867_v58, %v2985_v50  ;;  %v1877_v62 = vsel %vm1876_vm9, %v1870_v24, 0.0 }
 0xb57   : > { %1878 = vadd.xlane.f32.xlu0 %v1877_v62 }
 0xb58   : > { %1873 = vst.msk [vmem:[%s2841_s14 + $0x8] sm:$0xff] %vm879_vm2, %v1871_v60 }
 0xbe4   : > { %v1879_v63 = vpop.xlane.xlu0 %1878 }
 0xbe5   : > { %v1880_v0 = vmul.f32 0.03125, %v1879_v63 }
 0xbe7   : > { %v1881_v1 = vsub.f32 %v1870_v24, %v1880_v0 }
 0xbe9   : > { %v1882_v2 = vmul.f32 %v1881_v1, %v1881_v1 }
 0xbeb   : > { %v1883_v47 = vsel %vm1876_vm9, %v1882_v2, 0.0 }
 0xbec   : > { %1884 = vadd.xlane.f32.xlu1 %v1883_v47 }
 0xc79   : > { %v1885_v3 = vpop.xlane.xlu1 %1884 }
 0xc7a   : > { %v1886_v4 = vmul.f32 0.03125, %v1885_v3 }
 0xc7c   : > { %v1887_v50 = vadd.f32 1e-05, %v1886_v4 }
 0xc7e   : > { %2459 = vrsqrt.f32 %v1887_v50 }
 0xc88   : > { %v2460_v61 = vpop.eup %2459 }
 0xc89   : > { %v1889_v6 = vmul.f32 %v2460_v61, %v1881_v1 }
 0xc8b   : > { %v1890_v8 = vmul.f32 %v1889_v6, %v1874_v5 }
 0xc8d   : > { %v1891_v9 = vadd.f32 %v1890_v8, %v1875_v7 }
 0xc8f   : > { %1892 = vst.msk [vmem:[%s2790_s23] sm:$0x1] %vm1876_vm9, %v1891_v9 }
 0xc90   : > { %2474 = shalt.err (!%p2471_p9)
}
 0xc91   : > { %s2475_s23 = scalar_lea.hbm %s3054_s26, 16  ;;  %s2479_s14 = scalar_lea.hbm %s3183_s15, 32 }
 0xc92   : > { %p2476_p10 = scmp.ne.s32.totalorder %s3054_s26, %s2475_s23  ;;  %p2480_p13 = scmp.lt.u32.totalorder %s3054_s26, %s3183_s15 }
 0xc93   : > { %p2481_p0 = scmp.lt.u32.totalorder %s2479_s14, %s2475_s23  ;;  %p2483_p2 = scmp.lt.u32.totalorder %s2475_s23, %s3054_s26 }
 0xc94   : > { %p2477_p11 = pnand %p2476_p10, %p2709_p3 }
 0xc95   : > { %p2482_p1 = por %p2481_p0, %p2480_p13 }
 0xc96   : > { %p2478_p12 = pneg %p2477_p11 }
 0xc97   : > { %p2484_p4 = por %p2483_p2, %p2482_p1 }
 0xc99   : > { %p2485_p5 = pnand %p2484_p4, %p2478_p12 }
 0xc9b   : > { %2488 = shalt.err (!%p2485_p5)
}
 0xc9c   : > { %2286 = dma.vmem_to_hbm [thread:$0]  (%p2709_p3), %s3056_s1, 16, %s3054_s26, %s1894_s6  }
 0xc9d PF: > { %s3185_s30 = sld [smem:[#allocation11_spill]]  ;;  %s3186_s5 = sld [smem:[#allocation6_spill]] }
 0xca3   : > { %p2292_p6 = scmp.ge.s32.totalorder %s3185_s30, 2  ;;  %s1918_s18 = sand.u32 1, %s3186_s5  }
 0xca4   : > { %s1919_s16 = scalar_lea.sflag [#allocation4], %s1918_s18 }
 0xca5   : > { %p2289_p7 = pnand %p2292_p6, %p2720_p8 }
 0xca7   : > { %2522 = dma.done.wait (!%p2289_p7), %s1919_s16, 16  }
 0xca8   : > { %2524 = vsyncadd (!%p2289_p7), %s1919_s16, 4294967280  ;;  %s29_s28 = sadd.s32 1, %s3185_s30   ;;  %s3188_s29 = sld [smem:[#allocation7_spill]] }
 0xca9   : > { %p26_p9 = scmp.ge.s32.totalorder %s29_s28, 6   ;;  %s3189_s23 = sld [smem:[#allocation15_spill]] }
 0xcaa   : > { %s3190_s24 = sld [smem:[#allocation9_spill]]  ;;  %s3191_s25 = sld [smem:[#allocation10_spill]] }
 0xcab   : > { %s3192_s26 = sld [smem:[#allocation12_spill]]  ;;  %s3193_s27 = sld [smem:[#allocation14_spill]] }
 0xcac   : > { %s3194_s21 = smov %s2531_s22  ;;  %28 = sbr.rel (!%p26_p9) target bundleno = 14 (0xe), region = 158 }
 0xcae   : > { %s3195_s22 = smov %s3188_s29 }
 0xcb3   :  { %1923 = vsyncpa [#allocation4], 1 }
 0xcb4   :  { %1925 = vsyncpa [#allocation4 + $0x1], 1 }

</bundles_post_ra>
